<compile_context>
chip_gen: v7x
topology: tpu7x:2x2x1
jax: 0.10.0
libtpu: 0.0.40
codegen_flags: <defaults>
</compile_context>

<pallas_src>
import functools

import numpy as np
import jax
import jax.numpy as jnp
from jax import lax
from jax.experimental import pallas as pl
from jax.experimental.pallas import tpu as pltpu


NEG_INF = -1e18


# --------------------------------------------------------------------------
# Parameter slab layout (shared by the host-side packer and the kernel).
# Every entry starts at an 8-aligned sublane row, lane offset 0.
# --------------------------------------------------------------------------
def _slab_layout(D, H):
    def up8(x):
        return -(-x // 8) * 8

    entries = [
        ("w_ih",    D, 4 * H),
        ("w_hh",    H, 4 * H),
        ("wm",      D, 2 * H),   # concat(attn_wm, hop_wm) along columns
        ("attn_wq", H, H),
        ("hop_wq",  H, H),
        ("attn_v",  1, H),
        ("hop_v",   1, H),
        ("b",       1, 4 * H),
        ("init_i",  1, D),
        ("init_h",  1, H),
        ("init_c",  1, H),
    ]
    C = -(-max(c for _, _, c in entries) // 128) * 128
    layout, off = {}, 0
    for name, r, c in entries:
        layout[name] = (off, r, c)
        off = up8(off + r)
    return layout, up8(off), C


def _pack_params(params):
    """Host-side: pack all weights into one [rows, 128] f32 slab (done once)."""
    D, H = np.asarray(params["attn_wm"]).shape
    layout, R, C = _slab_layout(D, H)
    slab = np.zeros((R, C), np.float32)

    def put(name, arr):
        off, r, c = layout[name]
        a = np.asarray(arr, np.float32)
        assert a.shape == (r, c), (name, a.shape, (r, c))
        slab[off:off + r, :c] = a

    put("w_ih", params["w_ih"])
    put("w_hh", params["w_hh"])
    put("wm", np.concatenate([np.asarray(params["attn_wm"]),
                              np.asarray(params["hop_wm"])], axis=1))
    put("attn_wq", params["attn_wq"])
    put("hop_wq", params["hop_wq"])
    put("attn_v", params["attn_v"])
    put("hop_v", params["hop_v"])
    put("b", params["b"])
    put("init_i", params["init_i"])
    put("init_h", params["init_h"])
    put("init_c", params["init_c"])
    return jnp.asarray(slab)


# --------------------------------------------------------------------------
# Kernel
# --------------------------------------------------------------------------
def _make_kernel(n_step, n_hop, N, D, H):
    layout, _, _ = _slab_layout(D, H)

    def get(ref, name):
        off, r, c = layout[name]
        return ref[off:off + r, 0:c]

    def kernel(attn_mem_ref, slab_ref, out_ref):
        f32 = jnp.float32
        mm = functools.partial(jnp.dot, preferred_element_type=f32)

        # ---- prologue: hoist weights; all "big" matmuls happen once --------
        attn_mem = attn_mem_ref[...]                    # [N, D]
        w_ih = get(slab_ref, "w_ih")                    # [D, 4H]
        w_hh = get(slab_ref, "w_hh")                    # [H, 4H]
        attn_wq = get(slab_ref, "attn_wq")              # [H, H]
        hop_wq = get(slab_ref, "hop_wq")                # [H, H]
        attn_v = get(slab_ref, "attn_v")                # [1, H]
        hop_v = get(slab_ref, "hop_v")                  # [1, H]
        b = get(slab_ref, "b")                          # [1, 4H]

        feats = mm(attn_mem, get(slab_ref, "wm"))       # [N, 2H]
        attn_feat = feats[:, 0:H]                       # [N, H]
        hop_feat = feats[:, H:2 * H]                    # [N, H]

        # Associativity folds (off the serial decode chain):
        G = mm(attn_mem, w_ih)                          # [N, 4H]  gather fold
        P_hop = mm(hop_feat, hop_wq)                    # [N, H]   hop>=2 proj
        P_attn = mm(hop_feat, attn_wq)                  # [N, H]   pointer proj

        iota = lax.broadcasted_iota(jnp.int32, (1, N), 1)
        mask = jnp.zeros((1, N), f32)                   # additive mask carry
        g_x = mm(get(slab_ref, "init_i"), w_ih)         # [1, 4H] input contrib
        h = get(slab_ref, "init_h")                     # [1, H]
        c = get(slab_ref, "init_c")                     # [1, H]

        def row_scores(feat, proj, v_row):
            # lane-major unnormalized attention scores: [1, N]
            s = jnp.tanh(feat + proj)                   # [N, H]
            return lax.dot_general(v_row, s, (((1,), (1,)), ((), ())),
                                   preferred_element_type=f32)

        # ---- fully-unrolled greedy decode loop ------------------------------
        for t in range(n_step):
            # single-layer LSTM cell; input contribution g_x was pre-folded
            # through w_ih, so only h @ w_hh is on the per-step chain.
            # (PyTorch gate order: i, f, g, o)
            gates = g_x + mm(h, w_hh) + b               # [1, 4H]
            sig = jax.nn.sigmoid(gates)                 # whole-vreg EUP pass
            tnh = jnp.tanh(gates)                       # whole-vreg EUP pass
            i_g = sig[:, 0:H]
            f_g = sig[:, H:2 * H]
            g_g = tnh[:, 2 * H:3 * H]
            o_g = sig[:, 3 * H:4 * H]
            c = f_g * c + i_g * g_g
            h = o_g * jnp.tanh(c)                       # [1, H]

            # n_hop glimpse attention; q is never materialized — only its
            # projections through hop_wq / attn_wq (folded via P_hop / P_attn).
            proj = mm(h, hop_wq)                        # hop-0 projection
            w = None
            for hop in range(n_hop):
                sc = row_scores(hop_feat, proj, hop_v)              # [1, N]
                sc = sc - jnp.max(sc, axis=-1, keepdims=True)
                e = jnp.exp(sc)
                inv = pl.reciprocal(jnp.sum(e, axis=-1, keepdims=True),
                                    approx=True)
                w = e * inv                                         # [1, N]
                if hop + 1 < n_hop:
                    proj = mm(w, P_hop)                             # [1, H]

            # pointer score, masked greedy argmax (first max on ties)
            proj_a = mm(h, attn_wq) if n_hop == 0 else mm(w, P_attn)
            sc = row_scores(attn_feat, proj_a, attn_v)              # [1, N]
            masked = sc + mask
            mx = jnp.max(masked, axis=-1, keepdims=True)            # [1, 1]
            cand = jnp.where(masked == mx, iota, N)                 # [1, N]
            idx_vec = jnp.min(cand, axis=-1, keepdims=True)         # [1, 1]
            onehot = (iota == idx_vec)                              # [1, N]

            out_ref[t] = jnp.min(idx_vec)               # reuse idx_vec -> SMEM
            mask = jnp.where(onehot, NEG_INF, mask)
            g_x = mm(onehot.astype(f32), G)             # next input's gates

    return kernel


# --------------------------------------------------------------------------
# Wrapper factory: packs the slab ONCE and returns a jitted callable.
# --------------------------------------------------------------------------
def make_ptr_extractor_rl(params, n_step, n_hop, num_sents, input_dim):
    N, D = int(num_sents), int(input_dim)
    H = int(np.asarray(params["attn_wm"]).shape[1])
    assert n_step <= N, "n_step > num_sents: masked picks would repeat"

    slab = _pack_params(params)                 # packed + H2D once
    kernel = _make_kernel(n_step, n_hop, N, D, H)
    vmem = pl.BlockSpec(memory_space=pltpu.MemorySpace.VMEM)
    call = pl.pallas_call(
        kernel,
        out_shape=jax.ShapeDtypeStruct((n_step,), jnp.int32),
        in_specs=[vmem, vmem],
        out_specs=pl.BlockSpec(memory_space=pltpu.MemorySpace.SMEM),
    )

    @jax.jit
    def _run(attn_mem, slab_):
        return call(attn_mem.astype(jnp.float32), slab_)

    return lambda attn_mem: _run(attn_mem, slab)


def ptr_extractor_rl(attn_mem, params, n_step, n_hop):
    """One-shot convenience wrapper (prefer make_ptr_extractor_rl in serving)."""
    N, D = attn_mem.shape
    return make_ptr_extractor_rl(params, n_step, n_hop, N, D)(attn_mem)


# --------------------------------------------------------------------------
# float64 numpy reference (free-running greedy, or teacher-forced scoring)
# --------------------------------------------------------------------------
def _np_sigmoid(x):
    return 1.0 / (1.0 + np.exp(-x))


def ptr_extractor_rl_ref(attn_mem, params, n_step, n_hop, force_idx=None):
    p = {k: np.asarray(v, np.float64) for k, v in params.items()}
    am = np.asarray(attn_mem, np.float64)
    H = p["attn_wm"].shape[1]
    attn_feat = am @ p["attn_wm"]
    hop_feat = am @ p["hop_wm"]
    x, h, c = p["init_i"], p["init_h"], p["init_c"]
    picked, step_scores = [], []
    for t in range(n_step):
        gates = x @ p["w_ih"] + h @ p["w_hh"] + p["b"]
        i_g = _np_sigmoid(gates[:, :H])
        f_g = _np_sigmoid(gates[:, H:2 * H])
        g_g = np.tanh(gates[:, 2 * H:3 * H])
        o_g = _np_sigmoid(gates[:, 3 * H:])
        c = f_g * c + i_g * g_g
        h = o_g * np.tanh(c)
        q = h
        for _ in range(n_hop):
            s = np.tanh(hop_feat + q @ p["hop_wq"])
            sc = (s @ p["hop_v"].T)[:, 0]
            e = np.exp(sc - sc.max())
            w = e / e.sum()
            q = (w[:, None] * hop_feat).sum(axis=0, keepdims=True)
        s = np.tanh(attn_feat + q @ p["attn_wq"])
        sc = (s @ p["attn_v"].T)[:, 0].copy()
        for o in picked:
            sc[o] = NEG_INF
        step_scores.append(sc)
        idx = int(np.argmax(sc)) if force_idx is None else int(force_idx[t])
        picked.append(idx)
        x = am[idx:idx + 1, :]
    return np.asarray(picked, np.int32), step_scores


def init_params(key, input_dim, hidden):
    D, H = input_dim, hidden
    ks = jax.random.split(key, 12)
    s = 0.1
    nrm = lambda k, shape: (s * jax.random.normal(k, shape)).astype(jnp.float32)
    return {
        "attn_wm": nrm(ks[0], (D, H)),
        "attn_wq": nrm(ks[1], (H, H)),
        "attn_v":  nrm(ks[2], (1, H)),      # torch: [H]
        "hop_wm":  nrm(ks[3], (D, H)),
        "hop_wq":  nrm(ks[4], (H, H)),
        "hop_v":   nrm(ks[5], (1, H)),      # torch: [H]
        "w_ih":    nrm(ks[6], (D, 4 * H)),  # torch LSTM weight_ih_l0.T
        "w_hh":    nrm(ks[7], (H, 4 * H)),  # torch LSTM weight_hh_l0.T
        "b":       nrm(ks[8], (1, 4 * H)),  # b_ih + b_hh combined
        "init_i":  nrm(ks[9], (1, D)),      # torch: [D]
        "init_h":  nrm(ks[10], (1, H)),     # torch: [n_layer=1, H]
        "init_c":  nrm(ks[11], (1, H)),
    }


if __name__ == "__main__":
    N_SENTS, INPUT_DIM, HIDDEN = 8, 32, 32
    N_STEP, N_HOP = 4, 2

    key = jax.random.PRNGKey(0)
    k_params, k_mem = jax.random.split(key)
    params = init_params(k_params, INPUT_DIM, HIDDEN)
    attn_mem = jax.random.normal(k_mem, (N_SENTS, INPUT_DIM), jnp.float32)

    # Pack the slab once, jit the wrapper once, then call.
    extractor = make_ptr_extractor_rl(params, N_STEP, N_HOP, N_SENTS, INPUT_DIM)
    idx_kernel = np.asarray(jax.block_until_ready(extractor(attn_mem)))

    # structural checks
    assert idx_kernel.shape == (N_STEP,)
    assert np.all((idx_kernel >= 0) & (idx_kernel < N_SENTS))
    assert len(set(idx_kernel.tolist())) == N_STEP  # masking => distinct picks

    # semantic check: every kernel pick must be (near-)optimal under the
    # kernel's own decode history (tolerance covers DEFAULT-precision matmuls,
    # the associativity folds, and the approximate softmax reciprocal)
    idx_ref, ref_scores = ptr_extractor_rl_ref(attn_mem, params, N_STEP, N_HOP)
    _, forced_scores = ptr_extractor_rl_ref(attn_mem, params, N_STEP, N_HOP,
                                            force_idx=idx_kernel)
    for t in range(N_STEP):
        sc = forced_scores[t]
        assert sc[idx_kernel[t]] >= sc.max() - 5e-2, (t, idx_kernel, sc)

    # exact match is required whenever decision margins dwarf matmul rounding
    gaps = [float(np.sort(s)[-1] - np.sort(s)[-2]) for s in ref_scores]
    if min(gaps) > 2e-1:
        assert np.array_equal(idx_kernel, idx_ref), (idx_kernel, idx_ref)

    print("KERNEL_OK")
</pallas_src>

<mosaic_0001>
module attributes {stable_mosaic.version = 11 : i64} {
  func.func @kernel(%arg0: memref<8x32xf32, #tpu.memory_space<vmem>>, %arg1: memref<208x128xf32, #tpu.memory_space<vmem>>, %arg2: memref<4xi32, #tpu.memory_space<smem>>) attributes {dimension_semantics = [], scalar_prefetch = 0 : i64, scratch_operands = 0 : i64, tpu.core_type = #tpu.core_type<tc>} {
    %c0 = arith.constant 0 : index
    %c0_0 = arith.constant 0 : index
    %0 = vector.load %arg0[%c0, %c0_0] : memref<8x32xf32, #tpu.memory_space<vmem>>, vector<8x32xf32>
    %c0_1 = arith.constant 0 : index
    %c0_2 = arith.constant 0 : index
    %1 = vector.load %arg1[%c0_1, %c0_2] : memref<208x128xf32, #tpu.memory_space<vmem>>, vector<32x128xf32>
    %c32 = arith.constant 32 : index
    %c0_3 = arith.constant 0 : index
    %2 = vector.load %arg1[%c32, %c0_3] : memref<208x128xf32, #tpu.memory_space<vmem>>, vector<32x128xf32>
    %c96 = arith.constant 96 : index
    %c0_4 = arith.constant 0 : index
    %3 = vector.load %arg1[%c96, %c0_4] : memref<208x128xf32, #tpu.memory_space<vmem>>, vector<32x32xf32>
    %c128 = arith.constant 128 : index
    %c0_5 = arith.constant 0 : index
    %4 = vector.load %arg1[%c128, %c0_5] : memref<208x128xf32, #tpu.memory_space<vmem>>, vector<32x32xf32>
    %c160 = arith.constant 160 : index
    %c0_6 = arith.constant 0 : index
    %5 = vector.load %arg1[%c160, %c0_6] : memref<208x128xf32, #tpu.memory_space<vmem>>, vector<1x32xf32>
    %c168 = arith.constant 168 : index
    %c0_7 = arith.constant 0 : index
    %6 = vector.load %arg1[%c168, %c0_7] : memref<208x128xf32, #tpu.memory_space<vmem>>, vector<1x32xf32>
    %c176 = arith.constant 176 : index
    %c0_8 = arith.constant 0 : index
    %7 = vector.load %arg1[%c176, %c0_8] : memref<208x128xf32, #tpu.memory_space<vmem>>, vector<1x128xf32>
    %c64 = arith.constant 64 : index
    %c0_9 = arith.constant 0 : index
    %8 = vector.load %arg1[%c64, %c0_9] : memref<208x128xf32, #tpu.memory_space<vmem>>, vector<32x64xf32>
    %cst = arith.constant dense<0.000000e+00> : vector<8x64xf32>
    %9 = tpu.matmul %0, %8, %cst {dimension_numbers = #tpu.dot_dimension_numbers<[1], [0], [0], [1], [0, 0, 1, 1], [], []>} : vector<8x32xf32>, vector<32x64xf32>, vector<8x64xf32> -> vector<8x64xf32>
    %10 = vector.extract_strided_slice %9 {offsets = [0, 0], sizes = [8, 32], strides = [1, 1]} : vector<8x64xf32> to vector<8x32xf32>
    %11 = vector.extract_strided_slice %9 {offsets = [0, 32], sizes = [8, 32], strides = [1, 1]} : vector<8x64xf32> to vector<8x32xf32>
    %cst_10 = arith.constant dense<0.000000e+00> : vector<8x128xf32>
    %12 = tpu.matmul %0, %1, %cst_10 {dimension_numbers = #tpu.dot_dimension_numbers<[1], [0], [0], [1], [0, 0, 1, 1], [], []>} : vector<8x32xf32>, vector<32x128xf32>, vector<8x128xf32> -> vector<8x128xf32>
    %cst_11 = arith.constant dense<0.000000e+00> : vector<8x32xf32>
    %13 = tpu.matmul %11, %4, %cst_11 {dimension_numbers = #tpu.dot_dimension_numbers<[1], [0], [0], [1], [0, 0, 1, 1], [], []>} : vector<8x32xf32>, vector<32x32xf32>, vector<8x32xf32> -> vector<8x32xf32>
    %cst_12 = arith.constant dense<0.000000e+00> : vector<8x32xf32>
    %14 = tpu.matmul %11, %3, %cst_12 {dimension_numbers = #tpu.dot_dimension_numbers<[1], [0], [0], [1], [0, 0, 1, 1], [], []>} : vector<8x32xf32>, vector<32x32xf32>, vector<8x32xf32> -> vector<8x32xf32>
    %15 = tpu.iota {dimensions = array<i32: 1>} : vector<1x8xi32>
    %cst_13 = arith.constant 0.000000e+00 : f32
    %16 = vector.broadcast %cst_13 : f32 to vector<1x8xf32>
    %c184 = arith.constant 184 : index
    %c0_14 = arith.constant 0 : index
    %17 = vector.load %arg1[%c184, %c0_14] : memref<208x128xf32, #tpu.memory_space<vmem>>, vector<1x32xf32>
    %cst_15 = arith.constant dense<0.000000e+00> : vector<1x128xf32>
    %18 = tpu.matmul %17, %1, %cst_15 {dimension_numbers = #tpu.dot_dimension_numbers<[1], [0], [0], [1], [0, 0, 1, 1], [], []>} : vector<1x32xf32>, vector<32x128xf32>, vector<1x128xf32> -> vector<1x128xf32>
    %c192 = arith.constant 192 : index
    %c0_16 = arith.constant 0 : index
    %19 = vector.load %arg1[%c192, %c0_16] : memref<208x128xf32, #tpu.memory_space<vmem>>, vector<1x32xf32>
    %c200 = arith.constant 200 : index
    %c0_17 = arith.constant 0 : index
    %20 = vector.load %arg1[%c200, %c0_17] : memref<208x128xf32, #tpu.memory_space<vmem>>, vector<1x32xf32>
    %cst_18 = arith.constant dense<0.000000e+00> : vector<1x128xf32>
    %21 = tpu.matmul %19, %2, %cst_18 {dimension_numbers = #tpu.dot_dimension_numbers<[1], [0], [0], [1], [0, 0, 1, 1], [], []>} : vector<1x32xf32>, vector<32x128xf32>, vector<1x128xf32> -> vector<1x128xf32>
    %22 = arith.addf %18, %21 : vector<1x128xf32>
    %23 = arith.addf %22, %7 : vector<1x128xf32>
    %24 = arith.negf %23 : vector<1x128xf32>
    %25 = math.exp %24 : vector<1x128xf32>
    %cst_19 = arith.constant 1.000000e+00 : f32
    %26 = vector.broadcast %cst_19 : f32 to vector<1x128xf32>
    %27 = arith.addf %26, %25 : vector<1x128xf32>
    %28 = arith.divf %26, %27 : vector<1x128xf32>
    %29 = math.tanh %23 : vector<1x128xf32>
    %30 = vector.extract_strided_slice %28 {offsets = [0, 0], sizes = [1, 32], strides = [1, 1]} : vector<1x128xf32> to vector<1x32xf32>
    %31 = vector.extract_strided_slice %28 {offsets = [0, 32], sizes = [1, 32], strides = [1, 1]} : vector<1x128xf32> to vector<1x32xf32>
    %32 = vector.extract_strided_slice %29 {offsets = [0, 64], sizes = [1, 32], strides = [1, 1]} : vector<1x128xf32> to vector<1x32xf32>
    %33 = vector.extract_strided_slice %28 {offsets = [0, 96], sizes = [1, 32], strides = [1, 1]} : vector<1x128xf32> to vector<1x32xf32>
    %34 = arith.mulf %31, %20 : vector<1x32xf32>
    %35 = arith.mulf %30, %32 : vector<1x32xf32>
    %36 = arith.addf %34, %35 : vector<1x32xf32>
    %37 = math.tanh %36 : vector<1x32xf32>
    %38 = arith.mulf %33, %37 : vector<1x32xf32>
    %cst_20 = arith.constant dense<0.000000e+00> : vector<1x32xf32>
    %39 = tpu.matmul %38, %4, %cst_20 {dimension_numbers = #tpu.dot_dimension_numbers<[1], [0], [0], [1], [0, 0, 1, 1], [], []>} : vector<1x32xf32>, vector<32x32xf32>, vector<1x32xf32> -> vector<1x32xf32>
    %40 = vector.broadcast %39 : vector<1x32xf32> to vector<8x32xf32>
    %41 = arith.addf %11, %40 : vector<8x32xf32>
    %42 = math.tanh %41 : vector<8x32xf32>
    %cst_21 = arith.constant dense<0.000000e+00> : vector<1x8xf32>
    %43 = tpu.matmul %6, %42, %cst_21 {dimension_numbers = #tpu.dot_dimension_numbers<[1], [1], [0], [0], [0, 0, 1, 0], [], []>} : vector<1x32xf32>, vector<8x32xf32>, vector<1x8xf32> -> vector<1x8xf32>
    %cst_22 = arith.constant dense<0xFF800000> : vector<1xf32>
    %44 = vector.multi_reduction <maximumf>, %43, %cst_22 [1] : vector<1x8xf32> to vector<1xf32>
    %45 = vector.shape_cast %44 : vector<1xf32> to vector<1x1xf32>
    %46 = vector.broadcast %45 : vector<1x1xf32> to vector<1x8xf32>
    %47 = arith.subf %43, %46 : vector<1x8xf32>
    %48 = math.exp %47 : vector<1x8xf32>
    %cst_23 = arith.constant dense<0.000000e+00> : vector<1xf32>
    %49 = vector.multi_reduction <add>, %48, %cst_23 [1] : vector<1x8xf32> to vector<1xf32>
    %50 = vector.shape_cast %49 : vector<1xf32> to vector<1x1xf32>
    %51 = tpu.reciprocal %50 {approx = true} : vector<1x1xf32> -> vector<1x1xf32>
    %52 = vector.broadcast %51 : vector<1x1xf32> to vector<1x8xf32>
    %53 = arith.mulf %48, %52 : vector<1x8xf32>
    %cst_24 = arith.constant dense<0.000000e+00> : vector<1x32xf32>
    %54 = tpu.matmul %53, %13, %cst_24 {dimension_numbers = #tpu.dot_dimension_numbers<[1], [0], [0], [1], [0, 0, 1, 1], [], []>} : vector<1x8xf32>, vector<8x32xf32>, vector<1x32xf32> -> vector<1x32xf32>
    %55 = vector.broadcast %54 : vector<1x32xf32> to vector<8x32xf32>
    %56 = arith.addf %11, %55 : vector<8x32xf32>
    %57 = math.tanh %56 : vector<8x32xf32>
    %cst_25 = arith.constant dense<0.000000e+00> : vector<1x8xf32>
    %58 = tpu.matmul %6, %57, %cst_25 {dimension_numbers = #tpu.dot_dimension_numbers<[1], [1], [0], [0], [0, 0, 1, 0], [], []>} : vector<1x32xf32>, vector<8x32xf32>, vector<1x8xf32> -> vector<1x8xf32>
    %cst_26 = arith.constant dense<0xFF800000> : vector<1xf32>
    %59 = vector.multi_reduction <maximumf>, %58, %cst_26 [1] : vector<1x8xf32> to vector<1xf32>
    %60 = vector.shape_cast %59 : vector<1xf32> to vector<1x1xf32>
    %61 = vector.broadcast %60 : vector<1x1xf32> to vector<1x8xf32>
    %62 = arith.subf %58, %61 : vector<1x8xf32>
    %63 = math.exp %62 : vector<1x8xf32>
    %cst_27 = arith.constant dense<0.000000e+00> : vector<1xf32>
    %64 = vector.multi_reduction <add>, %63, %cst_27 [1] : vector<1x8xf32> to vector<1xf32>
    %65 = vector.shape_cast %64 : vector<1xf32> to vector<1x1xf32>
    %66 = tpu.reciprocal %65 {approx = true} : vector<1x1xf32> -> vector<1x1xf32>
    %67 = vector.broadcast %66 : vector<1x1xf32> to vector<1x8xf32>
    %68 = arith.mulf %63, %67 : vector<1x8xf32>
    %cst_28 = arith.constant dense<0.000000e+00> : vector<1x32xf32>
    %69 = tpu.matmul %68, %14, %cst_28 {dimension_numbers = #tpu.dot_dimension_numbers<[1], [0], [0], [1], [0, 0, 1, 1], [], []>} : vector<1x8xf32>, vector<8x32xf32>, vector<1x32xf32> -> vector<1x32xf32>
    %70 = vector.broadcast %69 : vector<1x32xf32> to vector<8x32xf32>
    %71 = arith.addf %10, %70 : vector<8x32xf32>
    %72 = math.tanh %71 : vector<8x32xf32>
    %cst_29 = arith.constant dense<0.000000e+00> : vector<1x8xf32>
    %73 = tpu.matmul %5, %72, %cst_29 {dimension_numbers = #tpu.dot_dimension_numbers<[1], [1], [0], [0], [0, 0, 1, 0], [], []>} : vector<1x32xf32>, vector<8x32xf32>, vector<1x8xf32> -> vector<1x8xf32>
    %74 = arith.addf %73, %16 : vector<1x8xf32>
    %cst_30 = arith.constant dense<0xFF800000> : vector<1xf32>
    %75 = vector.multi_reduction <maximumf>, %74, %cst_30 [1] : vector<1x8xf32> to vector<1xf32>
    %76 = vector.shape_cast %75 : vector<1xf32> to vector<1x1xf32>
    %77 = vector.broadcast %76 : vector<1x1xf32> to vector<1x8xf32>
    %78 = arith.cmpf oeq, %74, %77 : vector<1x8xf32>
    %c8_i32 = arith.constant 8 : i32
    %79 = vector.broadcast %c8_i32 : i32 to vector<1x8xi32>
    %80 = arith.select %78, %15, %79 : vector<1x8xi1>, vector<1x8xi32>
    %cst_31 = arith.constant dense<2147483647> : vector<1xi32>
    %81 = vector.multi_reduction <minsi>, %80, %cst_31 [1] : vector<1x8xi32> to vector<1xi32>
    %82 = vector.shape_cast %81 : vector<1xi32> to vector<1x1xi32>
    %83 = vector.broadcast %82 : vector<1x1xi32> to vector<1x8xi32>
    %84 = arith.cmpi eq, %15, %83 : vector<1x8xi32>
    %85 = vector.shape_cast %82 : vector<1x1xi32> to vector<1x1x1xi32>
    %cst_32 = arith.constant dense<2147483647> : vector<1xi32>
    %86 = vector.multi_reduction <minsi>, %85, %cst_32 [1, 2] : vector<1x1x1xi32> to vector<1xi32>
    %87 = vector.shape_cast %86 : vector<1xi32> to vector<1x1x1xi32>
    %88 = vector.extract %87[0, 0, 0] : i32 from vector<1x1x1xi32>
    %c0_33 = arith.constant 0 : index
    %89 = memref.load %arg2[%c0_33] : memref<4xi32, #tpu.memory_space<smem>>
    memref.store %88, %arg2[%c0_33] : memref<4xi32, #tpu.memory_space<smem>>
    %cst_34 = arith.constant -9.99999984E+17 : f32
    %90 = vector.broadcast %cst_34 : f32 to vector<1x8xf32>
    %91 = arith.select %84, %90, %16 : vector<1x8xi1>, vector<1x8xf32>
    %92 = arith.extui %84 : vector<1x8xi1> to vector<1x8xi32>
    %93 = arith.sitofp %92 : vector<1x8xi32> to vector<1x8xf32>
    %cst_35 = arith.constant dense<0.000000e+00> : vector<1x128xf32>
    %94 = tpu.matmul %93, %12, %cst_35 {dimension_numbers = #tpu.dot_dimension_numbers<[1], [0], [0], [1], [0, 0, 1, 1], [], []>} : vector<1x8xf32>, vector<8x128xf32>, vector<1x128xf32> -> vector<1x128xf32>
    %cst_36 = arith.constant dense<0.000000e+00> : vector<1x128xf32>
    %95 = tpu.matmul %38, %2, %cst_36 {dimension_numbers = #tpu.dot_dimension_numbers<[1], [0], [0], [1], [0, 0, 1, 1], [], []>} : vector<1x32xf32>, vector<32x128xf32>, vector<1x128xf32> -> vector<1x128xf32>
    %96 = arith.addf %94, %95 : vector<1x128xf32>
    %97 = arith.addf %96, %7 : vector<1x128xf32>
    %98 = arith.negf %97 : vector<1x128xf32>
    %99 = math.exp %98 : vector<1x128xf32>
    %cst_37 = arith.constant 1.000000e+00 : f32
    %100 = vector.broadcast %cst_37 : f32 to vector<1x128xf32>
    %101 = arith.addf %100, %99 : vector<1x128xf32>
    %102 = arith.divf %100, %101 : vector<1x128xf32>
    %103 = math.tanh %97 : vector<1x128xf32>
    %104 = vector.extract_strided_slice %102 {offsets = [0, 0], sizes = [1, 32], strides = [1, 1]} : vector<1x128xf32> to vector<1x32xf32>
    %105 = vector.extract_strided_slice %102 {offsets = [0, 32], sizes = [1, 32], strides = [1, 1]} : vector<1x128xf32> to vector<1x32xf32>
    %106 = vector.extract_strided_slice %103 {offsets = [0, 64], sizes = [1, 32], strides = [1, 1]} : vector<1x128xf32> to vector<1x32xf32>
    %107 = vector.extract_strided_slice %102 {offsets = [0, 96], sizes = [1, 32], strides = [1, 1]} : vector<1x128xf32> to vector<1x32xf32>
    %108 = arith.mulf %105, %36 : vector<1x32xf32>
    %109 = arith.mulf %104, %106 : vector<1x32xf32>
    %110 = arith.addf %108, %109 : vector<1x32xf32>
    %111 = math.tanh %110 : vector<1x32xf32>
    %112 = arith.mulf %107, %111 : vector<1x32xf32>
    %cst_38 = arith.constant dense<0.000000e+00> : vector<1x32xf32>
    %113 = tpu.matmul %112, %4, %cst_38 {dimension_numbers = #tpu.dot_dimension_numbers<[1], [0], [0], [1], [0, 0, 1, 1], [], []>} : vector<1x32xf32>, vector<32x32xf32>, vector<1x32xf32> -> vector<1x32xf32>
    %114 = vector.broadcast %113 : vector<1x32xf32> to vector<8x32xf32>
    %115 = arith.addf %11, %114 : vector<8x32xf32>
    %116 = math.tanh %115 : vector<8x32xf32>
    %cst_39 = arith.constant dense<0.000000e+00> : vector<1x8xf32>
    %117 = tpu.matmul %6, %116, %cst_39 {dimension_numbers = #tpu.dot_dimension_numbers<[1], [1], [0], [0], [0, 0, 1, 0], [], []>} : vector<1x32xf32>, vector<8x32xf32>, vector<1x8xf32> -> vector<1x8xf32>
    %cst_40 = arith.constant dense<0xFF800000> : vector<1xf32>
    %118 = vector.multi_reduction <maximumf>, %117, %cst_40 [1] : vector<1x8xf32> to vector<1xf32>
    %119 = vector.shape_cast %118 : vector<1xf32> to vector<1x1xf32>
    %120 = vector.broadcast %119 : vector<1x1xf32> to vector<1x8xf32>
    %121 = arith.subf %117, %120 : vector<1x8xf32>
    %122 = math.exp %121 : vector<1x8xf32>
    %cst_41 = arith.constant dense<0.000000e+00> : vector<1xf32>
    %123 = vector.multi_reduction <add>, %122, %cst_41 [1] : vector<1x8xf32> to vector<1xf32>
    %124 = vector.shape_cast %123 : vector<1xf32> to vector<1x1xf32>
    %125 = tpu.reciprocal %124 {approx = true} : vector<1x1xf32> -> vector<1x1xf32>
    %126 = vector.broadcast %125 : vector<1x1xf32> to vector<1x8xf32>
    %127 = arith.mulf %122, %126 : vector<1x8xf32>
    %cst_42 = arith.constant dense<0.000000e+00> : vector<1x32xf32>
    %128 = tpu.matmul %127, %13, %cst_42 {dimension_numbers = #tpu.dot_dimension_numbers<[1], [0], [0], [1], [0, 0, 1, 1], [], []>} : vector<1x8xf32>, vector<8x32xf32>, vector<1x32xf32> -> vector<1x32xf32>
    %129 = vector.broadcast %128 : vector<1x32xf32> to vector<8x32xf32>
    %130 = arith.addf %11, %129 : vector<8x32xf32>
    %131 = math.tanh %130 : vector<8x32xf32>
    %cst_43 = arith.constant dense<0.000000e+00> : vector<1x8xf32>
    %132 = tpu.matmul %6, %131, %cst_43 {dimension_numbers = #tpu.dot_dimension_numbers<[1], [1], [0], [0], [0, 0, 1, 0], [], []>} : vector<1x32xf32>, vector<8x32xf32>, vector<1x8xf32> -> vector<1x8xf32>
    %cst_44 = arith.constant dense<0xFF800000> : vector<1xf32>
    %133 = vector.multi_reduction <maximumf>, %132, %cst_44 [1] : vector<1x8xf32> to vector<1xf32>
    %134 = vector.shape_cast %133 : vector<1xf32> to vector<1x1xf32>
    %135 = vector.broadcast %134 : vector<1x1xf32> to vector<1x8xf32>
    %136 = arith.subf %132, %135 : vector<1x8xf32>
    %137 = math.exp %136 : vector<1x8xf32>
    %cst_45 = arith.constant dense<0.000000e+00> : vector<1xf32>
    %138 = vector.multi_reduction <add>, %137, %cst_45 [1] : vector<1x8xf32> to vector<1xf32>
    %139 = vector.shape_cast %138 : vector<1xf32> to vector<1x1xf32>
    %140 = tpu.reciprocal %139 {approx = true} : vector<1x1xf32> -> vector<1x1xf32>
    %141 = vector.broadcast %140 : vector<1x1xf32> to vector<1x8xf32>
    %142 = arith.mulf %137, %141 : vector<1x8xf32>
    %cst_46 = arith.constant dense<0.000000e+00> : vector<1x32xf32>
    %143 = tpu.matmul %142, %14, %cst_46 {dimension_numbers = #tpu.dot_dimension_numbers<[1], [0], [0], [1], [0, 0, 1, 1], [], []>} : vector<1x8xf32>, vector<8x32xf32>, vector<1x32xf32> -> vector<1x32xf32>
    %144 = vector.broadcast %143 : vector<1x32xf32> to vector<8x32xf32>
    %145 = arith.addf %10, %144 : vector<8x32xf32>
    %146 = math.tanh %145 : vector<8x32xf32>
    %cst_47 = arith.constant dense<0.000000e+00> : vector<1x8xf32>
    %147 = tpu.matmul %5, %146, %cst_47 {dimension_numbers = #tpu.dot_dimension_numbers<[1], [1], [0], [0], [0, 0, 1, 0], [], []>} : vector<1x32xf32>, vector<8x32xf32>, vector<1x8xf32> -> vector<1x8xf32>
    %148 = arith.addf %147, %91 : vector<1x8xf32>
    %cst_48 = arith.constant dense<0xFF800000> : vector<1xf32>
    %149 = vector.multi_reduction <maximumf>, %148, %cst_48 [1] : vector<1x8xf32> to vector<1xf32>
    %150 = vector.shape_cast %149 : vector<1xf32> to vector<1x1xf32>
    %151 = vector.broadcast %150 : vector<1x1xf32> to vector<1x8xf32>
    %152 = arith.cmpf oeq, %148, %151 : vector<1x8xf32>
    %c8_i32_49 = arith.constant 8 : i32
    %153 = vector.broadcast %c8_i32_49 : i32 to vector<1x8xi32>
    %154 = arith.select %152, %15, %153 : vector<1x8xi1>, vector<1x8xi32>
    %cst_50 = arith.constant dense<2147483647> : vector<1xi32>
    %155 = vector.multi_reduction <minsi>, %154, %cst_50 [1] : vector<1x8xi32> to vector<1xi32>
    %156 = vector.shape_cast %155 : vector<1xi32> to vector<1x1xi32>
    %157 = vector.broadcast %156 : vector<1x1xi32> to vector<1x8xi32>
    %158 = arith.cmpi eq, %15, %157 : vector<1x8xi32>
    %159 = vector.shape_cast %156 : vector<1x1xi32> to vector<1x1x1xi32>
    %cst_51 = arith.constant dense<2147483647> : vector<1xi32>
    %160 = vector.multi_reduction <minsi>, %159, %cst_51 [1, 2] : vector<1x1x1xi32> to vector<1xi32>
    %161 = vector.shape_cast %160 : vector<1xi32> to vector<1x1x1xi32>
    %162 = vector.extract %161[0, 0, 0] : i32 from vector<1x1x1xi32>
    %c1 = arith.constant 1 : index
    %163 = memref.load %arg2[%c1] : memref<4xi32, #tpu.memory_space<smem>>
    memref.store %162, %arg2[%c1] : memref<4xi32, #tpu.memory_space<smem>>
    %cst_52 = arith.constant -9.99999984E+17 : f32
    %164 = vector.broadcast %cst_52 : f32 to vector<1x8xf32>
    %165 = arith.select %158, %164, %91 : vector<1x8xi1>, vector<1x8xf32>
    %166 = arith.extui %158 : vector<1x8xi1> to vector<1x8xi32>
    %167 = arith.sitofp %166 : vector<1x8xi32> to vector<1x8xf32>
    %cst_53 = arith.constant dense<0.000000e+00> : vector<1x128xf32>
    %168 = tpu.matmul %167, %12, %cst_53 {dimension_numbers = #tpu.dot_dimension_numbers<[1], [0], [0], [1], [0, 0, 1, 1], [], []>} : vector<1x8xf32>, vector<8x128xf32>, vector<1x128xf32> -> vector<1x128xf32>
    %cst_54 = arith.constant dense<0.000000e+00> : vector<1x128xf32>
    %169 = tpu.matmul %112, %2, %cst_54 {dimension_numbers = #tpu.dot_dimension_numbers<[1], [0], [0], [1], [0, 0, 1, 1], [], []>} : vector<1x32xf32>, vector<32x128xf32>, vector<1x128xf32> -> vector<1x128xf32>
    %170 = arith.addf %168, %169 : vector<1x128xf32>
    %171 = arith.addf %170, %7 : vector<1x128xf32>
    %172 = arith.negf %171 : vector<1x128xf32>
    %173 = math.exp %172 : vector<1x128xf32>
    %cst_55 = arith.constant 1.000000e+00 : f32
    %174 = vector.broadcast %cst_55 : f32 to vector<1x128xf32>
    %175 = arith.addf %174, %173 : vector<1x128xf32>
    %176 = arith.divf %174, %175 : vector<1x128xf32>
    %177 = math.tanh %171 : vector<1x128xf32>
    %178 = vector.extract_strided_slice %176 {offsets = [0, 0], sizes = [1, 32], strides = [1, 1]} : vector<1x128xf32> to vector<1x32xf32>
    %179 = vector.extract_strided_slice %176 {offsets = [0, 32], sizes = [1, 32], strides = [1, 1]} : vector<1x128xf32> to vector<1x32xf32>
    %180 = vector.extract_strided_slice %177 {offsets = [0, 64], sizes = [1, 32], strides = [1, 1]} : vector<1x128xf32> to vector<1x32xf32>
    %181 = vector.extract_strided_slice %176 {offsets = [0, 96], sizes = [1, 32], strides = [1, 1]} : vector<1x128xf32> to vector<1x32xf32>
    %182 = arith.mulf %179, %110 : vector<1x32xf32>
    %183 = arith.mulf %178, %180 : vector<1x32xf32>
    %184 = arith.addf %182, %183 : vector<1x32xf32>
    %185 = math.tanh %184 : vector<1x32xf32>
    %186 = arith.mulf %181, %185 : vector<1x32xf32>
    %cst_56 = arith.constant dense<0.000000e+00> : vector<1x32xf32>
    %187 = tpu.matmul %186, %4, %cst_56 {dimension_numbers = #tpu.dot_dimension_numbers<[1], [0], [0], [1], [0, 0, 1, 1], [], []>} : vector<1x32xf32>, vector<32x32xf32>, vector<1x32xf32> -> vector<1x32xf32>
    %188 = vector.broadcast %187 : vector<1x32xf32> to vector<8x32xf32>
    %189 = arith.addf %11, %188 : vector<8x32xf32>
    %190 = math.tanh %189 : vector<8x32xf32>
    %cst_57 = arith.constant dense<0.000000e+00> : vector<1x8xf32>
    %191 = tpu.matmul %6, %190, %cst_57 {dimension_numbers = #tpu.dot_dimension_numbers<[1], [1], [0], [0], [0, 0, 1, 0], [], []>} : vector<1x32xf32>, vector<8x32xf32>, vector<1x8xf32> -> vector<1x8xf32>
    %cst_58 = arith.constant dense<0xFF800000> : vector<1xf32>
    %192 = vector.multi_reduction <maximumf>, %191, %cst_58 [1] : vector<1x8xf32> to vector<1xf32>
    %193 = vector.shape_cast %192 : vector<1xf32> to vector<1x1xf32>
    %194 = vector.broadcast %193 : vector<1x1xf32> to vector<1x8xf32>
    %195 = arith.subf %191, %194 : vector<1x8xf32>
    %196 = math.exp %195 : vector<1x8xf32>
    %cst_59 = arith.constant dense<0.000000e+00> : vector<1xf32>
    %197 = vector.multi_reduction <add>, %196, %cst_59 [1] : vector<1x8xf32> to vector<1xf32>
    %198 = vector.shape_cast %197 : vector<1xf32> to vector<1x1xf32>
    %199 = tpu.reciprocal %198 {approx = true} : vector<1x1xf32> -> vector<1x1xf32>
    %200 = vector.broadcast %199 : vector<1x1xf32> to vector<1x8xf32>
    %201 = arith.mulf %196, %200 : vector<1x8xf32>
    %cst_60 = arith.constant dense<0.000000e+00> : vector<1x32xf32>
    %202 = tpu.matmul %201, %13, %cst_60 {dimension_numbers = #tpu.dot_dimension_numbers<[1], [0], [0], [1], [0, 0, 1, 1], [], []>} : vector<1x8xf32>, vector<8x32xf32>, vector<1x32xf32> -> vector<1x32xf32>
    %203 = vector.broadcast %202 : vector<1x32xf32> to vector<8x32xf32>
    %204 = arith.addf %11, %203 : vector<8x32xf32>
    %205 = math.tanh %204 : vector<8x32xf32>
    %cst_61 = arith.constant dense<0.000000e+00> : vector<1x8xf32>
    %206 = tpu.matmul %6, %205, %cst_61 {dimension_numbers = #tpu.dot_dimension_numbers<[1], [1], [0], [0], [0, 0, 1, 0], [], []>} : vector<1x32xf32>, vector<8x32xf32>, vector<1x8xf32> -> vector<1x8xf32>
    %cst_62 = arith.constant dense<0xFF800000> : vector<1xf32>
    %207 = vector.multi_reduction <maximumf>, %206, %cst_62 [1] : vector<1x8xf32> to vector<1xf32>
    %208 = vector.shape_cast %207 : vector<1xf32> to vector<1x1xf32>
    %209 = vector.broadcast %208 : vector<1x1xf32> to vector<1x8xf32>
    %210 = arith.subf %206, %209 : vector<1x8xf32>
    %211 = math.exp %210 : vector<1x8xf32>
    %cst_63 = arith.constant dense<0.000000e+00> : vector<1xf32>
    %212 = vector.multi_reduction <add>, %211, %cst_63 [1] : vector<1x8xf32> to vector<1xf32>
    %213 = vector.shape_cast %212 : vector<1xf32> to vector<1x1xf32>
    %214 = tpu.reciprocal %213 {approx = true} : vector<1x1xf32> -> vector<1x1xf32>
    %215 = vector.broadcast %214 : vector<1x1xf32> to vector<1x8xf32>
    %216 = arith.mulf %211, %215 : vector<1x8xf32>
    %cst_64 = arith.constant dense<0.000000e+00> : vector<1x32xf32>
    %217 = tpu.matmul %216, %14, %cst_64 {dimension_numbers = #tpu.dot_dimension_numbers<[1], [0], [0], [1], [0, 0, 1, 1], [], []>} : vector<1x8xf32>, vector<8x32xf32>, vector<1x32xf32> -> vector<1x32xf32>
    %218 = vector.broadcast %217 : vector<1x32xf32> to vector<8x32xf32>
    %219 = arith.addf %10, %218 : vector<8x32xf32>
    %220 = math.tanh %219 : vector<8x32xf32>
    %cst_65 = arith.constant dense<0.000000e+00> : vector<1x8xf32>
    %221 = tpu.matmul %5, %220, %cst_65 {dimension_numbers = #tpu.dot_dimension_numbers<[1], [1], [0], [0], [0, 0, 1, 0], [], []>} : vector<1x32xf32>, vector<8x32xf32>, vector<1x8xf32> -> vector<1x8xf32>
    %222 = arith.addf %221, %165 : vector<1x8xf32>
    %cst_66 = arith.constant dense<0xFF800000> : vector<1xf32>
    %223 = vector.multi_reduction <maximumf>, %222, %cst_66 [1] : vector<1x8xf32> to vector<1xf32>
    %224 = vector.shape_cast %223 : vector<1xf32> to vector<1x1xf32>
    %225 = vector.broadcast %224 : vector<1x1xf32> to vector<1x8xf32>
    %226 = arith.cmpf oeq, %222, %225 : vector<1x8xf32>
    %c8_i32_67 = arith.constant 8 : i32
    %227 = vector.broadcast %c8_i32_67 : i32 to vector<1x8xi32>
    %228 = arith.select %226, %15, %227 : vector<1x8xi1>, vector<1x8xi32>
    %cst_68 = arith.constant dense<2147483647> : vector<1xi32>
    %229 = vector.multi_reduction <minsi>, %228, %cst_68 [1] : vector<1x8xi32> to vector<1xi32>
    %230 = vector.shape_cast %229 : vector<1xi32> to vector<1x1xi32>
    %231 = vector.broadcast %230 : vector<1x1xi32> to vector<1x8xi32>
    %232 = arith.cmpi eq, %15, %231 : vector<1x8xi32>
    %233 = vector.shape_cast %230 : vector<1x1xi32> to vector<1x1x1xi32>
    %cst_69 = arith.constant dense<2147483647> : vector<1xi32>
    %234 = vector.multi_reduction <minsi>, %233, %cst_69 [1, 2] : vector<1x1x1xi32> to vector<1xi32>
    %235 = vector.shape_cast %234 : vector<1xi32> to vector<1x1x1xi32>
    %236 = vector.extract %235[0, 0, 0] : i32 from vector<1x1x1xi32>
    %c2 = arith.constant 2 : index
    %237 = memref.load %arg2[%c2] : memref<4xi32, #tpu.memory_space<smem>>
    memref.store %236, %arg2[%c2] : memref<4xi32, #tpu.memory_space<smem>>
    %cst_70 = arith.constant -9.99999984E+17 : f32
    %238 = vector.broadcast %cst_70 : f32 to vector<1x8xf32>
    %239 = arith.select %232, %238, %165 : vector<1x8xi1>, vector<1x8xf32>
    %240 = arith.extui %232 : vector<1x8xi1> to vector<1x8xi32>
    %241 = arith.sitofp %240 : vector<1x8xi32> to vector<1x8xf32>
    %cst_71 = arith.constant dense<0.000000e+00> : vector<1x128xf32>
    %242 = tpu.matmul %241, %12, %cst_71 {dimension_numbers = #tpu.dot_dimension_numbers<[1], [0], [0], [1], [0, 0, 1, 1], [], []>} : vector<1x8xf32>, vector<8x128xf32>, vector<1x128xf32> -> vector<1x128xf32>
    %cst_72 = arith.constant dense<0.000000e+00> : vector<1x128xf32>
    %243 = tpu.matmul %186, %2, %cst_72 {dimension_numbers = #tpu.dot_dimension_numbers<[1], [0], [0], [1], [0, 0, 1, 1], [], []>} : vector<1x32xf32>, vector<32x128xf32>, vector<1x128xf32> -> vector<1x128xf32>
    %244 = arith.addf %242, %243 : vector<1x128xf32>
    %245 = arith.addf %244, %7 : vector<1x128xf32>
    %246 = arith.negf %245 : vector<1x128xf32>
    %247 = math.exp %246 : vector<1x128xf32>
    %cst_73 = arith.constant 1.000000e+00 : f32
    %248 = vector.broadcast %cst_73 : f32 to vector<1x128xf32>
    %249 = arith.addf %248, %247 : vector<1x128xf32>
    %250 = arith.divf %248, %249 : vector<1x128xf32>
    %251 = math.tanh %245 : vector<1x128xf32>
    %252 = vector.extract_strided_slice %250 {offsets = [0, 0], sizes = [1, 32], strides = [1, 1]} : vector<1x128xf32> to vector<1x32xf32>
    %253 = vector.extract_strided_slice %250 {offsets = [0, 32], sizes = [1, 32], strides = [1, 1]} : vector<1x128xf32> to vector<1x32xf32>
    %254 = vector.extract_strided_slice %251 {offsets = [0, 64], sizes = [1, 32], strides = [1, 1]} : vector<1x128xf32> to vector<1x32xf32>
    %255 = vector.extract_strided_slice %250 {offsets = [0, 96], sizes = [1, 32], strides = [1, 1]} : vector<1x128xf32> to vector<1x32xf32>
    %256 = arith.mulf %253, %184 : vector<1x32xf32>
    %257 = arith.mulf %252, %254 : vector<1x32xf32>
    %258 = arith.addf %256, %257 : vector<1x32xf32>
    %259 = math.tanh %258 : vector<1x32xf32>
    %260 = arith.mulf %255, %259 : vector<1x32xf32>
    %cst_74 = arith.constant dense<0.000000e+00> : vector<1x32xf32>
    %261 = tpu.matmul %260, %4, %cst_74 {dimension_numbers = #tpu.dot_dimension_numbers<[1], [0], [0], [1], [0, 0, 1, 1], [], []>} : vector<1x32xf32>, vector<32x32xf32>, vector<1x32xf32> -> vector<1x32xf32>
    %262 = vector.broadcast %261 : vector<1x32xf32> to vector<8x32xf32>
    %263 = arith.addf %11, %262 : vector<8x32xf32>
    %264 = math.tanh %263 : vector<8x32xf32>
    %cst_75 = arith.constant dense<0.000000e+00> : vector<1x8xf32>
    %265 = tpu.matmul %6, %264, %cst_75 {dimension_numbers = #tpu.dot_dimension_numbers<[1], [1], [0], [0], [0, 0, 1, 0], [], []>} : vector<1x32xf32>, vector<8x32xf32>, vector<1x8xf32> -> vector<1x8xf32>
    %cst_76 = arith.constant dense<0xFF800000> : vector<1xf32>
    %266 = vector.multi_reduction <maximumf>, %265, %cst_76 [1] : vector<1x8xf32> to vector<1xf32>
    %267 = vector.shape_cast %266 : vector<1xf32> to vector<1x1xf32>
    %268 = vector.broadcast %267 : vector<1x1xf32> to vector<1x8xf32>
    %269 = arith.subf %265, %268 : vector<1x8xf32>
    %270 = math.exp %269 : vector<1x8xf32>
    %cst_77 = arith.constant dense<0.000000e+00> : vector<1xf32>
    %271 = vector.multi_reduction <add>, %270, %cst_77 [1] : vector<1x8xf32> to vector<1xf32>
    %272 = vector.shape_cast %271 : vector<1xf32> to vector<1x1xf32>
    %273 = tpu.reciprocal %272 {approx = true} : vector<1x1xf32> -> vector<1x1xf32>
    %274 = vector.broadcast %273 : vector<1x1xf32> to vector<1x8xf32>
    %275 = arith.mulf %270, %274 : vector<1x8xf32>
    %cst_78 = arith.constant dense<0.000000e+00> : vector<1x32xf32>
    %276 = tpu.matmul %275, %13, %cst_78 {dimension_numbers = #tpu.dot_dimension_numbers<[1], [0], [0], [1], [0, 0, 1, 1], [], []>} : vector<1x8xf32>, vector<8x32xf32>, vector<1x32xf32> -> vector<1x32xf32>
    %277 = vector.broadcast %276 : vector<1x32xf32> to vector<8x32xf32>
    %278 = arith.addf %11, %277 : vector<8x32xf32>
    %279 = math.tanh %278 : vector<8x32xf32>
    %cst_79 = arith.constant dense<0.000000e+00> : vector<1x8xf32>
    %280 = tpu.matmul %6, %279, %cst_79 {dimension_numbers = #tpu.dot_dimension_numbers<[1], [1], [0], [0], [0, 0, 1, 0], [], []>} : vector<1x32xf32>, vector<8x32xf32>, vector<1x8xf32> -> vector<1x8xf32>
    %cst_80 = arith.constant dense<0xFF800000> : vector<1xf32>
    %281 = vector.multi_reduction <maximumf>, %280, %cst_80 [1] : vector<1x8xf32> to vector<1xf32>
    %282 = vector.shape_cast %281 : vector<1xf32> to vector<1x1xf32>
    %283 = vector.broadcast %282 : vector<1x1xf32> to vector<1x8xf32>
    %284 = arith.subf %280, %283 : vector<1x8xf32>
    %285 = math.exp %284 : vector<1x8xf32>
    %cst_81 = arith.constant dense<0.000000e+00> : vector<1xf32>
    %286 = vector.multi_reduction <add>, %285, %cst_81 [1] : vector<1x8xf32> to vector<1xf32>
    %287 = vector.shape_cast %286 : vector<1xf32> to vector<1x1xf32>
    %288 = tpu.reciprocal %287 {approx = true} : vector<1x1xf32> -> vector<1x1xf32>
    %289 = vector.broadcast %288 : vector<1x1xf32> to vector<1x8xf32>
    %290 = arith.mulf %285, %289 : vector<1x8xf32>
    %cst_82 = arith.constant dense<0.000000e+00> : vector<1x32xf32>
    %291 = tpu.matmul %290, %14, %cst_82 {dimension_numbers = #tpu.dot_dimension_numbers<[1], [0], [0], [1], [0, 0, 1, 1], [], []>} : vector<1x8xf32>, vector<8x32xf32>, vector<1x32xf32> -> vector<1x32xf32>
    %292 = vector.broadcast %291 : vector<1x32xf32> to vector<8x32xf32>
    %293 = arith.addf %10, %292 : vector<8x32xf32>
    %294 = math.tanh %293 : vector<8x32xf32>
    %cst_83 = arith.constant dense<0.000000e+00> : vector<1x8xf32>
    %295 = tpu.matmul %5, %294, %cst_83 {dimension_numbers = #tpu.dot_dimension_numbers<[1], [1], [0], [0], [0, 0, 1, 0], [], []>} : vector<1x32xf32>, vector<8x32xf32>, vector<1x8xf32> -> vector<1x8xf32>
    %296 = arith.addf %295, %239 : vector<1x8xf32>
    %cst_84 = arith.constant dense<0xFF800000> : vector<1xf32>
    %297 = vector.multi_reduction <maximumf>, %296, %cst_84 [1] : vector<1x8xf32> to vector<1xf32>
    %298 = vector.shape_cast %297 : vector<1xf32> to vector<1x1xf32>
    %299 = vector.broadcast %298 : vector<1x1xf32> to vector<1x8xf32>
    %300 = arith.cmpf oeq, %296, %299 : vector<1x8xf32>
    %c8_i32_85 = arith.constant 8 : i32
    %301 = vector.broadcast %c8_i32_85 : i32 to vector<1x8xi32>
    %302 = arith.select %300, %15, %301 : vector<1x8xi1>, vector<1x8xi32>
    %cst_86 = arith.constant dense<2147483647> : vector<1xi32>
    %303 = vector.multi_reduction <minsi>, %302, %cst_86 [1] : vector<1x8xi32> to vector<1xi32>
    %304 = vector.shape_cast %303 : vector<1xi32> to vector<1x1xi32>
    %305 = vector.shape_cast %304 : vector<1x1xi32> to vector<1x1x1xi32>
    %cst_87 = arith.constant dense<2147483647> : vector<1xi32>
    %306 = vector.multi_reduction <minsi>, %305, %cst_87 [1, 2] : vector<1x1x1xi32> to vector<1xi32>
    %307 = vector.shape_cast %306 : vector<1xi32> to vector<1x1x1xi32>
    %308 = vector.extract %307[0, 0, 0] : i32 from vector<1x1x1xi32>
    %c3 = arith.constant 3 : index
    %309 = memref.load %arg2[%c3] : memref<4xi32, #tpu.memory_space<smem>>
    memref.store %308, %arg2[%c3] : memref<4xi32, #tpu.memory_space<smem>>
    return
  }
}

</mosaic_0001>

<bundles_post_ra>
// kernel: _run.1
= control target key start
LH: loop header
LB: loop body
LE: loop exit
PB: predicated region body
PF: predicated region fallthrough
CT: control target
= control target key end

     0   :  { %7 = vsyncpa [#allocation3], 0  ;;  %s4266_s0 = inlined_call_operand.hbm [shape: f32[8,32], index: 0, kind: input, shape index: {}]   ;;  %s4267_s1 = inlined_call_operand.hbm [shape: f32[208,128], index: 1, kind: input, shape index: {}]   ;;  %s4268_s2 = inlined_call_operand.hbm [shape: s32[4], index: 2, kind: output, shape index: {}]  }
   0x1   :  { %8 = vsyncpa [#allocation6], 0 }
   0x2   :  { %9 = vsyncpa [#allocation4], 0  ;;  %s3799_s9 = smov [#allocation2]   ;;  %s3800_s11 = smov [#allocation5]  }
   0x3   :  { %s16_s10 = sshll.u32 %s3799_s9, 4  ;;  %s25_s12 = sshll.u32 %s3800_s11, 4  ;;  %s17_s10 = int_to_ptr.vmem [resolvable:$true] %s16_s10  ;;  %s3825_s12 = int_to_ptr.vmem [resolvable:$true] %s25_s12 }
   0x4   :  { %s3739_s15 = scalar_lea.hbm %s4266_s0, 128 }
   0x5   :  { %p3740_p0 = scmp.ne.s32.totalorder %s4266_s0, %s3739_s15  ;;  %p3743_p1 = scmp.lt.u32.totalorder %s3739_s15, %s4266_s0 }
   0x7   :  { %p3745_p2 = pnand %p3743_p1, %p3740_p0 }
   0x9   :  { %3748 = shalt.err (!%p3745_p2)
}
   0xa   :  { %s3749_s20 = scalar_lea.vmem %s17_s10, 128  ;;  %p3754_p4 = scmp.lt.s32.totalorder %s17_s10, %s17_s10 }
   0xb   :  { %p3750_p3 = scmp.ne.s32.totalorder %s17_s10, %s3749_s20  ;;  %p3755_p5 = scmp.lt.s32.totalorder %s3749_s20, %s3749_s20 }
   0xd   :  { %p3756_p6 = por %p3755_p5, %p3754_p4 }
   0xf   :  { %p3757_p7 = pnand %p3756_p6, %p3750_p3 }
  0x11   :  { %3760 = shalt.err (!%p3757_p7)
}
  0x12   :  { %19 = dma.hbm_to_vmem [thread:$0]  %s4266_s0, 128, %s17_s10, [#allocation3]  }
  0x13   :  { %s3761_s25 = scalar_lea.hbm %s4267_s1, 3328 }
  0x14   :  { %p3762_p8 = scmp.ne.s32.totalorder %s4267_s1, %s3761_s25  ;;  %p3765_p9 = scmp.lt.u32.totalorder %s3761_s25, %s4267_s1 }
  0x16   :  { %p3767_p10 = pnand %p3765_p9, %p3762_p8 }
  0x18   :  { %3770 = shalt.err (!%p3767_p10)
}
  0x19   :  { %s3771_s30 = scalar_lea.vmem %s3825_s12, 3328  ;;  %p3776_p12 = scmp.lt.s32.totalorder %s3825_s12, %s3825_s12 }
  0x1a   :  { %p3772_p11 = scmp.ne.s32.totalorder %s3825_s12, %s3771_s30  ;;  %p3777_p13 = scmp.lt.s32.totalorder %s3771_s30, %s3771_s30 }
  0x1c   :  { %p3778_p0 = por %p3777_p13, %p3776_p12 }
  0x1e   :  { %p3779_p1 = pnand %p3778_p0, %p3772_p11 }
  0x20   :  { %3782 = shalt.err (!%p3779_p1)
}
  0x21   :  { %s3801_s0 = smov 128   ;;  %s3802_s3 = smov 8  }
  0x22   :  { %31 = dma.hbm_to_vmem [thread:$0]  %s4267_s1, 3328, %s3825_s12, [#allocation6], %s3801_s0, %s3801_s0, %s3802_s3  }
  0x23   :  { %3793 = dma.done.wait [#allocation3], 128  }
  0x24   :  { %3794 = vsyncadd [#allocation3], 4294967168 }
  0x25   :  { %3795 = dma.done.wait [#allocation6], 3328  }
  0x26   :  { %3796 = vsyncadd [#allocation6], 4294963968  ;;  %v3803_v0 = vmov 0.0|0.0   ;;  %vm3804_vm0 = vmmov 0   ;;  %v3805_v1 = vmov 0.0   ;;  %v58_v2 = vld [vmem:[#allocation5 + $0x40] sm:$0xff] }
  0x27   :  { %3554 = vmatprep.subr.bf16.mxu0 %v3803_v0  ;;  %3304 = vmatprep.mubr.msk.f32.mxu0 %vm3804_vm0, %v3805_v1  ;;  %v59_v3 = vld [vmem:[#allocation5 + $0x48] sm:$0xff]  ;;  %v60_v4 = vld [vmem:[#allocation5 + $0x50] sm:$0xff]  ;;  %v61_v6 = vld [vmem:[#allocation5 + $0x58] sm:$0xff]  ;;  %vm62_vm1 = vcmask 261120   ;;  %s3806_s1 = smov 32   ;;  %s3807_s6 = smov 96  }
  0x28   :  { %3560 = vmatprep.subr.bf16.mxu1 %v3803_v0  ;;  %3315 = vmatprep.mubr.msk.f32.mxu1 %vm3804_vm0, %v3805_v1  ;;  %v3555_v5 = vpack.c.bf16 %v59_v3, %v58_v2  ;;  %v3558_v7 = vpack.c.bf16 %v61_v6, %v60_v4  ;;  %v38_v8 = vld [vmem:[#allocation2] sm:$0xff]  ;;  %v39_v9 = vld [vmem:[#allocation5] sm:$0xff]  ;;  %v40_v10 = vld [vmem:[#allocation5 + $0x8] sm:$0xff]  ;;  %s3808_s7 = smov 64   ;;  %vm694_vm2 = vcmask 57344   ;;  %vm706_vm3 = vcmask 64512  }
  0x29   :  { %v41_v11 = vld [vmem:[#allocation5 + $0x10] sm:$0xff]  ;;  %v3561_v12 = vpack.c.bf16 %v40_v10, %v39_v9  ;;  %v42_v13 = vld [vmem:[#allocation5 + $0x18] sm:$0xff]  ;;  %v51_v14 = vld [vmem:[#allocation5 + $0x80] sm:$0xff]  ;;  %s3783_s14 = scalar_lea.hbm %s4268_s2, 16 }
  0x2a   :  { %3556 = vmatpush3.bf16.msra.mxu0 %v3555_v5  ;;  %v52_v15 = vld [vmem:[#allocation5 + $0x88] sm:$0xff]  ;;  %v53_v17 = vld [vmem:[#allocation5 + $0x90] sm:$0xff]  ;;  %v3564_v18 = vpack.c.bf16 %v42_v13, %v41_v11  ;;  %v54_v19 = vld [vmem:[#allocation5 + $0x98] sm:$0xff]  ;;  %v351_v5 = vlaneseq  ;;  %p3784_p2 = scmp.ne.s32.totalorder %s4268_s2, %s3783_s14  ;;  %p3787_p3 = scmp.lt.u32.totalorder %s3783_s14, %s4268_s2 }
  0x2b   :  { %3557 = vmatprep.subr.bf16.mxu0 %v3803_v0  ;;  %v3867_v16 = vpack.c.bf16 %v52_v15, %v51_v14  ;;  %3562 = vmatpush3.bf16.msra.mxu1 %v3561_v12  ;;  %v47_v20 = vld [vmem:[#allocation5 + $0x60] sm:$0xff]  ;;  %v48_v21 = vld [vmem:[#allocation5 + $0x68] sm:$0xff]  ;;  %v3871_v22 = vpack.c.bf16 %v54_v19, %v53_v17  ;;  %v49_v24 = vld [vmem:[#allocation5 + $0x70] sm:$0xff] }
  0x2c   :  { %3563 = vmatprep.subr.bf16.mxu1 %v3803_v0  ;;  %v3573_v23 = vpack.c.bf16 %v48_v21, %v47_v20  ;;  %v50_v25 = vld [vmem:[#allocation5 + $0x78] sm:$0xff]  ;;  %v355_v27 = vld [vmem:[#allocation5 + $0xc8] sm:$0x1]  ;;  %v43_v32 = vld [vmem:[#allocation5 + $0x20] sm:$0xff]  ;;  %v607_v6 = vshrl.u32 %v351_v5, 7  ;;  %p3789_p4 = pnand %p3787_p3, %p3784_p2 }
  0x2d   :  { %v3576_v26 = vpack.c.bf16 %v50_v25, %v49_v24  ;;  %511 = vrot.lane.b32.xlu1 %v355_v27, %s3806_s1  ;;  %v44_v33 = vld [vmem:[#allocation5 + $0x28] sm:$0xff]  ;;  %v45_v35 = vld [vmem:[#allocation5 + $0x30] sm:$0xff]  ;;  %v46_v36 = vld [vmem:[#allocation5 + $0x38] sm:$0xff] }
  0x2e   :  { %3559 = vmatpush3.bf16.msra.mxu0 %v3558_v7  ;;  %v3889_v34 = vpack.c.bf16 %v44_v33, %v43_v32  ;;  %v3894_v38 = vpack.c.bf16 %v46_v36, %v45_v35  ;;  %v354_v39 = vld [vmem:[#allocation5 + $0xc0] sm:$0x1]  ;;  %v353_v40 = vld [vmem:[#allocation5 + $0xb8] sm:$0x1]  ;;  %v3919_v46 = vld [vmem:[#allocation5 + $0xb0] sm:$0x1] }
  0x2f   :  { %3566 = vmatprep.subr.bf16.mxu0 %v3803_v0  ;;  %3565 = vmatpush3.bf16.msra.mxu1 %v3564_v18  ;;  %v3936_v7 = vsub.s32 0, %v607_v6  ;;  %v3943_v15 = vld [vmem:[#allocation5 + $0xa8] sm:$0x1] }
  0x30   :  { %3572 = vmatprep.subr.bf16.mxu1 %v3803_v0 }
  0x31   :  { %3305 = vmatmul.mubr.msk.f32.vlgmr.msra.gmra.mrb[0].mxu0 %vm62_vm1, %v38_v8 }
  0x32   :  { %3326 = vmatprep.mubr.msk.f32.mxu0 %vm3804_vm0, %v3805_v1  ;;  %3568 = vmatpush3.bf16.msra.mxu0 %v3867_v16 }
  0x33   :  { %3569 = vmatprep.subr.bf16.mxu0 %v3803_v0  ;;  %3316 = vmatmul.mubr.msk.f32.vlgmr.msra.gmra.mrb[0].mxu1 %vm62_vm1, %v38_v8 }
  0x34   :  { %3574 = vmatpush3.bf16.msra.mxu1 %v3573_v23  ;;  %3337 = vmatprep.mubr.msk.f32.mxu1 %vm3804_vm0, %v3805_v1 }
  0x35   :  { %3575 = vmatprep.subr.bf16.mxu1 %v3803_v0 }
  0x36   :  { %3571 = vmatpush3.bf16.msra.mxu0 %v3871_v22 }
  0x37   :  { %3578 = vmatprep.subr.bf16.mxu0 %v3803_v0 }
  0x38   :  { %3577 = vmatpush3.bf16.msra.mxu1 %v3576_v26 }
  0x39   :  { %3584 = vmatprep.subr.bf16.mxu1 %v3803_v0 }
  0x9f   :  { %v512_v59 = vpop.permute.xlu1 %511 }
 0x104   :  { %v3883_v28 = vpop.f32.mrb[0].mxu0 }
 0x105   :  { %207 = vrot.lane.b32.xlu0 %v3883_v28, %s3807_s6  ;;  %v3306_v29 = vpop.f32.mrb[1].mxu0 }
 0x106   :  { %v3887_v30 = vpop.f32.mrb[0].mxu1 }
 0x107   :  { %v3317_v31 = vpop.f32.mrb[1].mxu1 }
 0x177   :  { %v208_v37 = vpop.permute.xlu0 %207 }
 0x178   :  { %3327 = vmatmul.mubr.msk.f32.vlgmr.msra.gmra.mrb[2].mxu0 %vm62_vm1, %v208_v37  ;;  %3338 = vmatmul.mubr.msk.f32.vlgmr.msra.gmra.mrb[2].mxu1 %vm62_vm1, %v208_v37 }
 0x179   :  { %3580 = vmatpush3.bf16.msra.mxu0 %v3889_v34  ;;  %3586 = vmatpush3.bf16.msra.mxu1 %v3561_v12 }
 0x17a   :  { %3581 = vmatprep.subr.bf16.mxu0 %v3803_v0  ;;  %3587 = vmatprep.subr.bf16.mxu1 %v3803_v0 }
 0x17b   :  { %3348 = vmatprep.mubr.msk.f32.mxu0 %vm3804_vm0, %v3805_v1  ;;  %3359 = vmatprep.mubr.msk.f32.mxu1 %vm3804_vm0, %v3805_v1 }
 0x17d   :  { %3583 = vmatpush3.bf16.msra.mxu0 %v3894_v38  ;;  %3589 = vmatpush3.bf16.msra.mxu1 %v3564_v18 }
 0x17e   :  { %3590 = vmatprep.subr.bf16.mxu0 %v3803_v0  ;;  %3373 = vmatprep.subr.mxu1 %v3805_v1 }
 0x180   :  { %3349 = vmatmul.mubr.msk.f32.vlgmr.msra.gmra.mrb[4].mxu0 %vm62_vm1, %v354_v39  ;;  %3360 = vmatmul.mubr.msk.f32.vlgmr.msra.gmra.mrb[4].mxu1 %vm62_vm1, %v353_v40 }
 0x181   :  { %3592 = vmatpush3.bf16.msra.mxu0 %v3867_v16  ;;  %3370 = vmatprep.mubr.msk.f32.mxu0 %vm3804_vm0, %v3805_v1 }
 0x182   :  { %3593 = vmatprep.subr.bf16.mxu0 %v3803_v0  ;;  %3375 = vmatprep.mubr.msk.f32.mxu1 %vm3804_vm0, %v3805_v1 }
 0x185   :  { %3595 = vmatpush3.bf16.msra.mxu0 %v3871_v22 }
 0x186   :  { %3383 = vmatprep.subr.mxu0 %v3805_v1 }
 0x24b   :  { %v3915_v41 = vpop.f32.mrb[2].mxu0  ;;  %v3917_v42 = vpop.f32.mrb[2].mxu1 }
 0x24c   :  { %v3328_v43 = vpop.f32.mrb[3].mxu0  ;;  %v3339_v44 = vpop.f32.mrb[3].mxu1 }
 0x253   :  { %v425_v45 = vpop.f32.mrb[4].mxu0  ;;  %v498_v47 = vpop.f32.mrb[4].mxu1 }
 0x254   :  { %v499_v48 = vadd.f32 %v498_v47, %v425_v45  ;;  %v3350_v49 = vpop.f32.mrb[5].mxu0  ;;  %v3361_v50 = vpop.f32.mrb[5].mxu1 }
 0x256   :  { %v502_v51 = vadd.f32 %v499_v48, %v3919_v46 }
 0x258   :  { %3651 = vtanh.f32 %v502_v51  ;;  %v3136_v53 = vmul.f32 -1.442695, %v502_v51 }
 0x25a   :  { %3653 = vpow2.f32 %v3136_v53 }
 0x262   :  { %v3652_v52 = vpop.eup %3651 }
 0x263   :  { %516 = vrot.lane.b32.xlu0 %v3652_v52, %s3808_s7 }
 0x264   :  { %v3654_v54 = vpop.eup %3653 }
 0x265   :  { %v506_v55 = vadd.f32 1.0, %v3654_v54 }
 0x267   :  { %3655 = vrcp.f32 %v506_v55 }
 0x271   :  { %v3656_v56 = vpop.eup %3655 }
 0x272   :  { %v514_v60 = vmul.f32 %v3656_v56, %v512_v59 }
 0x2d5   :  { %v517_v57 = vpop.permute.xlu0 %516 }
 0x2d6   :  { %v519_v58 = vmul.f32 %v3656_v56, %v517_v57 }
 0x2d8   :  { %521 = vrot.lane.b32.xlu1 %v519_v58, %s3806_s1 }
 0x34a   :  { %v522_v61 = vpop.permute.xlu1 %521 }
 0x34b   :  { %v3924_v62 = vadd.f32 %v522_v61, %v514_v60  ;;  %v3985_v61 = vld [vmem:[#allocation5 + $0xa0] sm:$0x1] }
 0x34d   :  { %3657 = vtanh.f32 %v3924_v62 }
 0x357   :  { %v3658_v63 = vpop.eup %3657 }
 0x358   :  { %527 = vrot.lane.b32.xlu0 %v3658_v63, %s3808_s7 }
 0x3ca   :  { %v528_v2 = vpop.permute.xlu0 %527 }
 0x3cb   :  { %v530_v3 = vmul.f32 %v3656_v56, %v528_v2 }
 0x3cd   :  { %532 = vrot.lane.b32.xlu1 %v530_v3, %s3806_s1 }
 0x43f   :  { %v3929_v4 = vpop.permute.xlu1 %532 }
 0x440   :  { %3371 = vmatmul.mubr.msk.f32.vlgmr.msra.gmra.mrb[6].mxu0 %vm62_vm1, %v3929_v4 }
 0x441   :  { %3385 = vmatprep.mubr.msk.f32.mxu0 %vm3804_vm0, %v3805_v1 }
 0x513   :  { %v602_v8 = vpop.f32.mrb[6].mxu0 }
 0x514   :  { %v609_v9 = vrot.slane %v602_v8, %v3936_v7  ;;  %v3372_v10 = vpop.f32.mrb[7].mxu0 }
 0x516   :  { %611 = vrot.lane.b32.xlu0 %v609_v9, %s3806_s1 }
 0x588   :  { %v612_v11 = vpop.permute.xlu0 %611 }
 0x589   :  { %v614_v12 = vadd.f32 %v612_v11, %v3883_v28 }
 0x58b   :  { %3659 = vtanh.f32 %v614_v12 }
 0x595   :  { %v3660_v13 = vpop.eup %3659 }
 0x596   :  { %617 = vrot.lane.b32.xlu1 %v3660_v13, %s3807_s6 }
 0x608   :  { %v618_v14 = vpop.permute.xlu1 %617 }
 0x609   :  { %3374 = vmatpush3.xpose.msk.msra.mxu1 %vm62_vm1, %v618_v14 }
 0x60a   :  { %3378 = vmatprep.subr.mxu1 %v3805_v1 }
 0x60c   :  { %3376 = vmatmul.mubr.msk.f32.vlgmr.msra.gmra.mrb[6].mxu1 %vm62_vm1, %v3943_v15 }
 0x60d   :  { %3379 = vmatpush3.msra.mxu1 %v3915_v41  ;;  %3380 = vmatprep.mubr.msk.f32.mxu1 %vm3804_vm0, %v3805_v1 }
 0x60e   :  { %3388 = vmatprep.subr.mxu1 %v3805_v1 }
 0x6df   :  { %v690_v17 = vpop.f32.mrb[6].mxu1 }
 0x6e0   :  { %v3377_v18 = vpop.f32.mrb[7].mxu1  ;;  %v695_v19 = vsel %vm694_vm2, %v690_v17, -inf }
 0x6e1   :  { %696 = vmax.xlane.f32.xlu0 %v695_v19 }
 0x76e   :  { %v697_v20 = vpop.xlane.xlu0 %696 }
 0x76f   :  { %v698_v21 = vsub.f32 %v690_v17, %v697_v20 }
 0x771   :  { %v699_v23 = vmul.f32 1.442695, %v698_v21 }
 0x773   :  { %3661 = vpow2.f32 %v699_v23 }
 0x77d   :  { %v3662_v24 = vpop.eup %3661 }
 0x77e   :  { %v701_v25 = vsel %vm694_vm2, %v3662_v24, 0.0 }
 0x77f   :  { %702 = vadd.xlane.f32.xlu1 %v701_v25 }
 0x80c   :  { %v703_v26 = vpop.xlane.xlu1 %702 }
 0x80d   :  { %3663 = vrcp.f32 %v703_v26 }
 0x817   :  { %v3664_v27 = vpop.eup %3663 }
 0x818   :  { %v705_v29 = vmul.f32 %v3664_v27, %v3662_v24 }
 0x81a   :  { %3381 = vmatmul.mubr.msk.f32.vlgmr.msra.gmra.mrb[8].mxu1 %vm706_vm3, %v705_v29 }
 0x81b   :  { %3389 = vmatpush3.msra.mxu1 %v3917_v42  ;;  %3390 = vmatprep.mubr.msk.f32.mxu1 %vm3804_vm0, %v3805_v1 }
 0x81c   :  { %3596 = vmatprep.subr.bf16.mxu1 %v3803_v0 }
 0x8ed   :  { %v776_v31 = vpop.f32.mrb[8].mxu1 }
 0x8ee   :  { %v783_v32 = vrot.slane %v776_v31, %v3936_v7  ;;  %v3382_v33 = vpop.f32.mrb[9].mxu1 }
 0x8f0   :  { %785 = vrot.lane.b32.xlu0 %v783_v32, %s3806_s1 }
 0x962   :  { %v786_v35 = vpop.permute.xlu0 %785 }
 0x963   :  { %v788_v36 = vadd.f32 %v786_v35, %v3883_v28 }
 0x965   :  { %3665 = vtanh.f32 %v788_v36 }
 0x96f   :  { %v3666_v37 = vpop.eup %3665 }
 0x970   :  { %791 = vrot.lane.b32.xlu1 %v3666_v37, %s3807_s6 }
 0x9e2   :  { %v792_v39 = vpop.permute.xlu1 %791 }
 0x9e3   :  { %3384 = vmatpush3.xpose.msk.msra.mxu0 %vm62_vm1, %v792_v39 }
 0x9e4   :  { %3393 = vmatprep.subr.mxu0 %v3805_v1 }
 0x9e6   :  { %3386 = vmatmul.mubr.msk.f32.vlgmr.msra.gmra.mrb[8].mxu0 %vm62_vm1, %v3943_v15 }
 0x9e7   :  { %3395 = vmatprep.mubr.msk.f32.mxu0 %vm3804_vm0, %v3805_v1 }
 0xab9   :  { %v861_v40 = vpop.f32.mrb[8].mxu0 }
 0xaba   :  { %v3387_v43 = vpop.f32.mrb[9].mxu0  ;;  %v865_v44 = vsel %vm694_vm2, %v861_v40, -inf }
 0xabb   :  { %866 = vmax.xlane.f32.xlu0 %v865_v44 }
 0xb48   :  { %v867_v45 = vpop.xlane.xlu0 %866 }
 0xb49   :  { %v868_v47 = vsub.f32 %v861_v40, %v867_v45 }
 0xb4b   :  { %v869_v48 = vmul.f32 1.442695, %v868_v47 }
 0xb4d   :  { %3667 = vpow2.f32 %v869_v48 }
 0xb57   :  { %v3668_v49 = vpop.eup %3667 }
 0xb58   :  { %v871_v50 = vsel %vm694_vm2, %v3668_v49, 0.0 }
 0xb59   :  { %872 = vadd.xlane.f32.xlu1 %v871_v50 }
 0xbe6   :  { %v873_v51 = vpop.xlane.xlu1 %872 }
 0xbe7   :  { %3669 = vrcp.f32 %v873_v51 }
 0xbf1   :  { %v3670_v52 = vpop.eup %3669 }
 0xbf2   :  { %v875_v53 = vmul.f32 %v3670_v52, %v3668_v49 }
 0xbf4   :  { %3391 = vmatmul.mubr.msk.f32.vlgmr.msra.gmra.mrb[10].mxu1 %vm706_vm3, %v875_v53 }
 0xbf5   :  { %3598 = vmatpush3.bf16.msra.mxu1 %v3889_v34  ;;  %3406 = vmatprep.mubr.msk.f32.mxu1 %vm3804_vm0, %v3805_v1 }
 0xbf6   :  { %3599 = vmatprep.subr.bf16.mxu1 %v3803_v0 }
 0xbf9   :  { %3601 = vmatpush3.bf16.msra.mxu1 %v3894_v38 }
 0xbfa   :  { %3425 = vmatprep.subr.mxu1 %v3805_v1 }
 0xbfc   :  { %3407 = vmatmul.mubr.msk.f32.vlgmr.msra.gmra.mrb[12].mxu1 %vm62_vm1, %v3929_v4  ;;  %v3996_v4 = vand.u32 127, %v351_v5 }
 0xbfd   :  { %3427 = vmatprep.mubr.msk.f32.mxu1 %vm3804_vm0, %v3805_v1 }
 0xcc7   :  { %v945_v54 = vpop.f32.mrb[10].mxu1 }
 0xcc8   :  { %v952_v55 = vrot.slane %v945_v54, %v3936_v7  ;;  %v3392_v56 = vpop.f32.mrb[11].mxu1 }
 0xcca   :  { %v953_v57 = vadd.f32 %v952_v55, %v3883_v28 }
 0xccc   :  { %3671 = vtanh.f32 %v953_v57 }
 0xccf   :  { %v1124_v58 = vpop.f32.mrb[12].mxu1 }
 0xcd0   :  { %v3408_v59 = vpop.f32.mrb[13].mxu1 }
 0xcd6   :  { %v3672_v60 = vpop.eup %3671 }
 0xcd7   :  { %3394 = vmatpush3.xpose.msk.msra.mxu0 %vm62_vm1, %v3672_v60 }
 0xcd8   :  { %3409 = vmatprep.subr.mxu0 %v3805_v1 }
 0xcda   :  { %3396 = vmatmul.mubr.msk.f32.vlgmr.msra.gmra.mrb[10].mxu0 %vm62_vm1, %v3985_v61 }
 0xcdb   :  { %3410 = vmatpush3.msra.mxu0 %v3887_v30  ;;  %3411 = vmatprep.mubr.msk.f32.mxu0 %vm3804_vm0, %v3805_v1 }
 0xcdc   :  { %3602 = vmatprep.subr.bf16.mxu0 %v3803_v0 }
 0xdad   :  { %v1027_v63 = vpop.f32.mrb[10].mxu0 }
 0xdae   :  { %v3397_v2 = vpop.f32.mrb[11].mxu0  ;;  %v1031_v3 = vsel %vm694_vm2, %v1027_v63, -inf }
 0xdaf   :  { %1032 = vmax.xlane.f32.xlu0 %v1031_v3 }
 0xe3c   :  { %v1033_v6 = vpop.xlane.xlu0 %1032 }
 0xe3d   :  { %vm1034_vm4 = vcmp.eq.f32.partialorder %v1027_v63, %v1033_v6 }
 0xe3e   :  { %v1035_v8 = vsel %vm1034_vm4, %v3996_v4, 8 }
 0xe3f   :  { %v1036_v9 = vsel %vm694_vm2, %v1035_v8, 2147483647 }
 0xe40   :  { %v1038_v10 = vshra.s32 %v1036_v9, 16  ;;  %v1037_v12 = vand.u32 65535, %v1036_v9 }
 0xe42   :  { %v1040_v11 = vcvt.s32.f32 %v1038_v10  ;;  %v1039_v14 = vcvt.s32.f32 %v1037_v12 }
 0xe44   :  { %1041 = vmin.xlane.f32.xlu0 %v1040_v11 }
 0xed1   :  { %v1042_v13 = vpop.xlane.xlu0 %1041 }
 0xed2   :  { %vm1043_vm5 = vcmp.eq.f32.partialorder %v1040_v11, %v1042_v13  ;;  %v1048_v18 = vcvt.f32.s32 %v1042_v13 }
 0xed3   :  { %v1044_v17 = vsel %vm1043_vm5, %v1039_v14, inf }
 0xed4   :  { %1045 = vmin.xlane.f32.xlu1 %v1044_v17  ;;  %v1049_v20 = vshll.u32 %v1048_v18, 16 }
 0xf61   :  { %v1046_v19 = vpop.xlane.xlu1 %1045 }
 0xf62   :  { %v1047_v5 = vcvt.f32.s32 %v1046_v19 }
 0xf64   :  { %v4000_v21 = vadd.s32 %v1049_v20, %v1047_v5 }
 0xf66   :  { %vm1051_vm6 = vcmp.eq.s32.totalorder %v3996_v4, %v4000_v21  ;;  %3632 = vpush %v4000_v21 }
 0xf67   :  { %v3146_v23 = vsel %vm1051_vm6, 1.0, %v3805_v1 }
 0xf68   :  { %3412 = vmatmul.mubr.msk.f32.vlgmr.msra.gmra.mrb[12].mxu0 %vm706_vm3, %v3146_v23 }
 0xf69   :  { %3604 = vmatpush3.bf16.msra.mxu0 %v3867_v16  ;;  %3422 = vmatprep.mubr.msk.f32.mxu0 %vm3804_vm0, %v3805_v1 }
 0xf6a   :  { %3605 = vmatprep.subr.bf16.mxu0 %v3803_v0 }
 0xf6d   :  { %3607 = vmatpush3.bf16.msra.mxu0 %v3871_v22 }
 0xf6e   :  { %3435 = vmatprep.subr.mxu0 %v3805_v1 }
 0xf97   :  { %s3633_s8 = spop %3632 }
 0xf98   :  { %1054 = sst [smem:[#allocation7]] %s3633_s8 }
0x103b   :  { %v1197_v24 = vpop.f32.mrb[12].mxu0 }
0x103c   :  { %v1198_v25 = vadd.f32 %v1197_v24, %v1124_v58  ;;  %v3413_v26 = vpop.f32.mrb[13].mxu0 }
0x103e   :  { %v1201_v27 = vadd.f32 %v1198_v25, %v3919_v46 }
0x1040   :  { %3673 = vtanh.f32 %v1201_v27  ;;  %v3149_v31 = vmul.f32 -1.442695, %v1201_v27 }
0x1042   :  { %3675 = vpow2.f32 %v3149_v31 }
0x104a   :  { %v3674_v29 = vpop.eup %3673 }
0x104b   :  { %1211 = vrot.lane.b32.xlu0 %v3674_v29, %s3808_s7 }
0x104c   :  { %v3676_v32 = vpop.eup %3675 }
0x104d   :  { %v1205_v33 = vadd.f32 1.0, %v3676_v32 }
0x104f   :  { %3677 = vrcp.f32 %v1205_v33 }
0x1059   :  { %v3678_v35 = vpop.eup %3677 }
0x105a   :  { %v1209_v39 = vmul.f32 %v3678_v35, %v3924_v62 }
0x10bd   :  { %v1212_v36 = vpop.permute.xlu0 %1211 }
0x10be   :  { %v1214_v37 = vmul.f32 %v3678_v35, %v1212_v36 }
0x10c0   :  { %1216 = vrot.lane.b32.xlu1 %v1214_v37, %s3806_s1 }
0x1132   :  { %v1217_v40 = vpop.permute.xlu1 %1216 }
0x1133   :  { %v4020_v43 = vadd.f32 %v1217_v40, %v1209_v39 }
0x1135   :  { %3679 = vtanh.f32 %v4020_v43 }
0x113f   :  { %v3680_v44 = vpop.eup %3679 }
0x1140   :  { %1222 = vrot.lane.b32.xlu1 %v3680_v44, %s3808_s7  ;;  %v4087_v44 = vsel %vm1051_vm6, -1e+18, %v3805_v1 }
0x11b2   :  { %v1223_v45 = vpop.permute.xlu1 %1222 }
0x11b3   :  { %v1225_v47 = vmul.f32 %v3678_v35, %v1223_v45 }
0x11b5   :  { %1227 = vrot.lane.b32.xlu0 %v1225_v47, %s3806_s1 }
0x1227   :  { %v4025_v48 = vpop.permute.xlu0 %1227 }
0x1228   :  { %3423 = vmatmul.mubr.msk.f32.vlgmr.msra.gmra.mrb[14].mxu0 %vm62_vm1, %v4025_v48 }
0x1229   :  { %3437 = vmatprep.mubr.msk.f32.mxu0 %vm3804_vm0, %v3805_v1 }
0x12fb   :  { %v1297_v62 = vpop.f32.mrb[14].mxu0 }
0x12fc   :  { %v1304_v49 = vrot.slane %v1297_v62, %v3936_v7  ;;  %v3424_v50 = vpop.f32.mrb[15].mxu0 }
0x12fe   :  { %1306 = vrot.lane.b32.xlu1 %v1304_v49, %s3806_s1 }
0x1370   :  { %v1307_v51 = vpop.permute.xlu1 %1306 }
0x1371   :  { %v1309_v52 = vadd.f32 %v1307_v51, %v3883_v28 }
0x1373   :  { %3681 = vtanh.f32 %v1309_v52 }
0x137d   :  { %v3682_v53 = vpop.eup %3681 }
0x137e   :  { %1312 = vrot.lane.b32.xlu0 %v3682_v53, %s3807_s6 }
0x13f0   :  { %v1313_v54 = vpop.permute.xlu0 %1312 }
0x13f1   :  { %3426 = vmatpush3.xpose.msk.msra.mxu1 %vm62_vm1, %v1313_v54 }
0x13f2   :  { %3430 = vmatprep.subr.mxu1 %v3805_v1 }
0x13f4   :  { %3428 = vmatmul.mubr.msk.f32.vlgmr.msra.gmra.mrb[14].mxu1 %vm62_vm1, %v3943_v15 }
0x13f5   :  { %3431 = vmatpush3.msra.mxu1 %v3915_v41  ;;  %3432 = vmatprep.mubr.msk.f32.mxu1 %vm3804_vm0, %v3805_v1 }
0x13f6   :  { %3440 = vmatprep.subr.mxu1 %v3805_v1 }
0x14c7   :  { %v1382_v55 = vpop.f32.mrb[14].mxu1 }
0x14c8   :  { %v3429_v56 = vpop.f32.mrb[15].mxu1  ;;  %v1386_v57 = vsel %vm694_vm2, %v1382_v55, -inf }
0x14c9   :  { %1387 = vmax.xlane.f32.xlu1 %v1386_v57 }
0x1556   :  { %v1388_v58 = vpop.xlane.xlu1 %1387 }
0x1557   :  { %v1389_v59 = vsub.f32 %v1382_v55, %v1388_v58 }
0x1559   :  { %v1390_v60 = vmul.f32 1.442695, %v1389_v59 }
0x155b   :  { %3683 = vpow2.f32 %v1390_v60 }
0x1565   :  { %v3684_v63 = vpop.eup %3683 }
0x1566   :  { %v1392_v2 = vsel %vm694_vm2, %v3684_v63, 0.0 }
0x1567   :  { %1393 = vadd.xlane.f32.xlu0 %v1392_v2 }
0x15f4   :  { %v1394_v3 = vpop.xlane.xlu0 %1393 }
0x15f5   :  { %3685 = vrcp.f32 %v1394_v3 }
0x15ff   :  { %v3686_v6 = vpop.eup %3685 }
0x1600   :  { %v1396_v8 = vmul.f32 %v3686_v6, %v3684_v63 }
0x1602   :  { %3433 = vmatmul.mubr.msk.f32.vlgmr.msra.gmra.mrb[16].mxu1 %vm706_vm3, %v1396_v8 }
0x1603   :  { %3441 = vmatpush3.msra.mxu1 %v3917_v42  ;;  %3442 = vmatprep.mubr.msk.f32.mxu1 %vm3804_vm0, %v3805_v1 }
0x1604   :  { %3608 = vmatprep.subr.bf16.mxu1 %v3803_v0 }
0x16d5   :  { %v1466_v9 = vpop.f32.mrb[16].mxu1 }
0x16d6   :  { %v1473_v10 = vrot.slane %v1466_v9, %v3936_v7  ;;  %v3434_v11 = vpop.f32.mrb[17].mxu1 }
0x16d8   :  { %1475 = vrot.lane.b32.xlu0 %v1473_v10, %s3806_s1 }
0x174a   :  { %v1476_v12 = vpop.permute.xlu0 %1475 }
0x174b   :  { %v1478_v13 = vadd.f32 %v1476_v12, %v3883_v28 }
0x174d   :  { %3687 = vtanh.f32 %v1478_v13 }
0x1757   :  { %v3688_v14 = vpop.eup %3687 }
0x1758   :  { %1481 = vrot.lane.b32.xlu1 %v3688_v14, %s3807_s6 }
0x17ca   :  { %v1482_v17 = vpop.permute.xlu1 %1481 }
0x17cb   :  { %3436 = vmatpush3.xpose.msk.msra.mxu0 %vm62_vm1, %v1482_v17 }
0x17cc   :  { %3445 = vmatprep.subr.mxu0 %v3805_v1 }
0x17ce   :  { %3438 = vmatmul.mubr.msk.f32.vlgmr.msra.gmra.mrb[16].mxu0 %vm62_vm1, %v3943_v15 }
0x17cf   :  { %3447 = vmatprep.mubr.msk.f32.mxu0 %vm3804_vm0, %v3805_v1 }
0x18a1   :  { %v1551_v18 = vpop.f32.mrb[16].mxu0 }
0x18a2   :  { %v3439_v19 = vpop.f32.mrb[17].mxu0  ;;  %v1555_v20 = vsel %vm694_vm2, %v1551_v18, -inf }
0x18a3   :  { %1556 = vmax.xlane.f32.xlu1 %v1555_v20 }
0x1930   :  { %v1557_v5 = vpop.xlane.xlu1 %1556 }
0x1931   :  { %v1558_v23 = vsub.f32 %v1551_v18, %v1557_v5 }
0x1933   :  { %v1559_v24 = vmul.f32 1.442695, %v1558_v23 }
0x1935   :  { %3689 = vpow2.f32 %v1559_v24 }
0x193f   :  { %v3690_v25 = vpop.eup %3689 }
0x1940   :  { %v1561_v26 = vsel %vm694_vm2, %v3690_v25, 0.0 }
0x1941   :  { %1562 = vadd.xlane.f32.xlu0 %v1561_v26 }
0x19ce   :  { %v1563_v27 = vpop.xlane.xlu0 %1562 }
0x19cf   :  { %3691 = vrcp.f32 %v1563_v27 }
0x19d9   :  { %v3692_v29 = vpop.eup %3691 }
0x19da   :  { %v1565_v31 = vmul.f32 %v3692_v29, %v3690_v25 }
0x19dc   :  { %3443 = vmatmul.mubr.msk.f32.vlgmr.msra.gmra.mrb[18].mxu1 %vm706_vm3, %v1565_v31 }
0x19dd   :  { %3610 = vmatpush3.bf16.msra.mxu1 %v3889_v34  ;;  %3458 = vmatprep.mubr.msk.f32.mxu1 %vm3804_vm0, %v3805_v1 }
0x19de   :  { %3611 = vmatprep.subr.bf16.mxu1 %v3803_v0 }
0x19e1   :  { %3613 = vmatpush3.bf16.msra.mxu1 %v3894_v38 }
0x19e2   :  { %3477 = vmatprep.subr.mxu1 %v3805_v1 }
0x19e4   :  { %3459 = vmatmul.mubr.msk.f32.vlgmr.msra.gmra.mrb[20].mxu1 %vm62_vm1, %v4025_v48 }
0x19e5   :  { %3479 = vmatprep.mubr.msk.f32.mxu1 %vm3804_vm0, %v3805_v1 }
0x1aaf   :  { %v1635_v32 = vpop.f32.mrb[18].mxu1 }
0x1ab0   :  { %v1642_v33 = vrot.slane %v1635_v32, %v3936_v7  ;;  %v3444_v35 = vpop.f32.mrb[19].mxu1 }
0x1ab2   :  { %v1643_v36 = vadd.f32 %v1642_v33, %v3883_v28 }
0x1ab4   :  { %3693 = vtanh.f32 %v1643_v36 }
0x1ab7   :  { %v1811_v37 = vpop.f32.mrb[20].mxu1 }
0x1ab8   :  { %v3460_v39 = vpop.f32.mrb[21].mxu1 }
0x1abe   :  { %v3694_v40 = vpop.eup %3693 }
0x1abf   :  { %3446 = vmatpush3.xpose.msk.msra.mxu0 %vm62_vm1, %v3694_v40 }
0x1ac0   :  { %3461 = vmatprep.subr.mxu0 %v3805_v1 }
0x1ac2   :  { %3448 = vmatmul.mubr.msk.f32.vlgmr.msra.gmra.mrb[18].mxu0 %vm62_vm1, %v3985_v61 }
0x1ac3   :  { %3462 = vmatpush3.msra.mxu0 %v3887_v30  ;;  %3463 = vmatprep.mubr.msk.f32.mxu0 %vm3804_vm0, %v3805_v1 }
0x1ac4   :  { %3614 = vmatprep.subr.bf16.mxu0 %v3803_v0 }
0x1b95   :  { %v1714_v45 = vpop.f32.mrb[18].mxu0 }
0x1b96   :  { %v1715_v47 = vadd.f32 %v1714_v45, %v4087_v44  ;;  %v3449_v48 = vpop.f32.mrb[19].mxu0 }
0x1b98   :  { %v1718_v62 = vsel %vm694_vm2, %v1715_v47, -inf }
0x1b99   :  { %1719 = vmax.xlane.f32.xlu0 %v1718_v62 }
0x1c26   :  { %v1720_v49 = vpop.xlane.xlu0 %1719 }
0x1c27   :  { %vm1721_vm7 = vcmp.eq.f32.partialorder %v1715_v47, %v1720_v49 }
0x1c28   :  { %v1722_v50 = vsel %vm1721_vm7, %v3996_v4, 8 }
0x1c29   :  { %v1723_v51 = vsel %vm694_vm2, %v1722_v50, 2147483647 }
0x1c2a   :  { %v1725_v52 = vshra.s32 %v1723_v51, 16  ;;  %v1724_v54 = vand.u32 65535, %v1723_v51 }
0x1c2c   :  { %v1727_v53 = vcvt.s32.f32 %v1725_v52  ;;  %v1726_v55 = vcvt.s32.f32 %v1724_v54 }
0x1c2e   :  { %1728 = vmin.xlane.f32.xlu1 %v1727_v53 }
0x1cbb   :  { %v1729_v21 = vpop.xlane.xlu1 %1728 }
0x1cbc   :  { %vm1730_vm8 = vcmp.eq.f32.partialorder %v1727_v53, %v1729_v21  ;;  %v1735_v57 = vcvt.f32.s32 %v1729_v21 }
0x1cbd   :  { %v1731_v56 = vsel %vm1730_vm8, %v1726_v55, inf }
0x1cbe   :  { %1732 = vmin.xlane.f32.xlu0 %v1731_v56  ;;  %v1736_v59 = vshll.u32 %v1735_v57, 16 }
0x1d4b   :  { %v1733_v58 = vpop.xlane.xlu0 %1732 }
0x1d4c   :  { %v1734_v60 = vcvt.f32.s32 %v1733_v58 }
0x1d4e   :  { %v4093_v63 = vadd.s32 %v1736_v59, %v1734_v60 }
0x1d50   :  { %vm1738_vm9 = vcmp.eq.s32.totalorder %v3996_v4, %v4093_v63  ;;  %3634 = vpush %v4093_v63 }
0x1d51   :  { %v3159_v2 = vsel %vm1738_vm9, 1.0, %v3805_v1 }
0x1d52   :  { %3464 = vmatmul.mubr.msk.f32.vlgmr.msra.gmra.mrb[20].mxu0 %vm706_vm3, %v3159_v2 }
0x1d53   :  { %3616 = vmatpush3.bf16.msra.mxu0 %v3867_v16  ;;  %3474 = vmatprep.mubr.msk.f32.mxu0 %vm3804_vm0, %v3805_v1 }
0x1d54   :  { %3617 = vmatprep.subr.bf16.mxu0 %v3803_v0 }
0x1d57   :  { %3619 = vmatpush3.bf16.msra.mxu0 %v3871_v22 }
0x1d58   :  { %3487 = vmatprep.subr.mxu0 %v3805_v1 }
0x1d81   :  { %s3635_s9 = spop %3634 }
0x1d82   :  { %1741 = sst [smem:[#allocation7 + $0x1]] %s3635_s9 }
0x1e25   :  { %v1884_v3 = vpop.f32.mrb[20].mxu0 }
0x1e26   :  { %v1885_v6 = vadd.f32 %v1884_v3, %v1811_v37  ;;  %v3465_v8 = vpop.f32.mrb[21].mxu0 }
0x1e28   :  { %v1888_v9 = vadd.f32 %v1885_v6, %v3919_v46 }
0x1e2a   :  { %3695 = vtanh.f32 %v1888_v9  ;;  %v3162_v11 = vmul.f32 -1.442695, %v1888_v9 }
0x1e2c   :  { %3697 = vpow2.f32 %v3162_v11 }
0x1e34   :  { %v3696_v10 = vpop.eup %3695 }
0x1e35   :  { %1898 = vrot.lane.b32.xlu1 %v3696_v10, %s3808_s7 }
0x1e36   :  { %v3698_v12 = vpop.eup %3697 }
0x1e37   :  { %v1892_v13 = vadd.f32 1.0, %v3698_v12 }
0x1e39   :  { %3699 = vrcp.f32 %v1892_v13 }
0x1e43   :  { %v3700_v14 = vpop.eup %3699 }
0x1e44   :  { %v1896_v19 = vmul.f32 %v3700_v14, %v4020_v43 }
0x1ea7   :  { %v1899_v17 = vpop.permute.xlu1 %1898 }
0x1ea8   :  { %v1901_v18 = vmul.f32 %v3700_v14, %v1899_v17 }
0x1eaa   :  { %1903 = vrot.lane.b32.xlu0 %v1901_v18, %s3806_s1 }
0x1f1c   :  { %v1904_v20 = vpop.permute.xlu0 %1903 }
0x1f1d   :  { %v4113_v5 = vadd.f32 %v1904_v20, %v1896_v19 }
0x1f1f   :  { %3701 = vtanh.f32 %v4113_v5 }
0x1f29   :  { %v3702_v23 = vpop.eup %3701 }
0x1f2a   :  { %1909 = vrot.lane.b32.xlu1 %v3702_v23, %s3808_s7 }
0x1f9c   :  { %v1910_v24 = vpop.permute.xlu1 %1909 }
0x1f9d   :  { %v1912_v25 = vmul.f32 %v3700_v14, %v1910_v24 }
0x1f9f   :  { %1914 = vrot.lane.b32.xlu1 %v1912_v25, %s3806_s1 }
0x2011   :  { %v4118_v26 = vpop.permute.xlu1 %1914 }
0x2012   :  { %3475 = vmatmul.mubr.msk.f32.vlgmr.msra.gmra.mrb[22].mxu0 %vm62_vm1, %v4118_v26 }
0x2013   :  { %3489 = vmatprep.mubr.msk.f32.mxu0 %vm3804_vm0, %v3805_v1 }
0x20e5   :  { %v1984_v43 = vpop.f32.mrb[22].mxu0 }
0x20e6   :  { %v1991_v27 = vrot.slane %v1984_v43, %v3936_v7  ;;  %v3476_v29 = vpop.f32.mrb[23].mxu0 }
0x20e8   :  { %1993 = vrot.lane.b32.xlu0 %v1991_v27, %s3806_s1 }
0x215a   :  { %v1994_v31 = vpop.permute.xlu0 %1993 }
0x215b   :  { %v1996_v32 = vadd.f32 %v1994_v31, %v3883_v28 }
0x215d   :  { %3703 = vtanh.f32 %v1996_v32 }
0x2167   :  { %v3704_v33 = vpop.eup %3703 }
0x2168   :  { %1999 = vrot.lane.b32.xlu1 %v3704_v33, %s3807_s6 }
0x21da   :  { %v2000_v35 = vpop.permute.xlu1 %1999 }
0x21db   :  { %3478 = vmatpush3.xpose.msk.msra.mxu1 %vm62_vm1, %v2000_v35 }
0x21dc   :  { %3482 = vmatprep.subr.mxu1 %v3805_v1 }
0x21de   :  { %3480 = vmatmul.mubr.msk.f32.vlgmr.msra.gmra.mrb[22].mxu1 %vm62_vm1, %v3943_v15 }
0x21df   :  { %3483 = vmatpush3.msra.mxu1 %v3915_v41  ;;  %3484 = vmatprep.mubr.msk.f32.mxu1 %vm3804_vm0, %v3805_v1 }
0x21e0   :  { %3492 = vmatprep.subr.mxu1 %v3805_v1 }
0x22b1   :  { %v2069_v36 = vpop.f32.mrb[22].mxu1 }
0x22b2   :  { %v3481_v37 = vpop.f32.mrb[23].mxu1  ;;  %v2073_v39 = vsel %vm694_vm2, %v2069_v36, -inf }
0x22b3   :  { %2074 = vmax.xlane.f32.xlu0 %v2073_v39 }
0x2340   :  { %v2075_v40 = vpop.xlane.xlu0 %2074 }
0x2341   :  { %v2076_v45 = vsub.f32 %v2069_v36, %v2075_v40 }
0x2343   :  { %v2077_v47 = vmul.f32 1.442695, %v2076_v45 }
0x2345   :  { %3705 = vpow2.f32 %v2077_v47 }
0x234f   :  { %v3706_v48 = vpop.eup %3705 }
0x2350   :  { %v2079_v62 = vsel %vm694_vm2, %v3706_v48, 0.0 }
0x2351   :  { %2080 = vadd.xlane.f32.xlu1 %v2079_v62 }
0x23de   :  { %v2081_v49 = vpop.xlane.xlu1 %2080 }
0x23df   :  { %3707 = vrcp.f32 %v2081_v49 }
0x23e9   :  { %v3708_v50 = vpop.eup %3707 }
0x23ea   :  { %v2083_v51 = vmul.f32 %v3708_v50, %v3706_v48 }
0x23ec   :  { %3485 = vmatmul.mubr.msk.f32.vlgmr.msra.gmra.mrb[24].mxu1 %vm706_vm3, %v2083_v51 }
0x23ed   :  { %3493 = vmatpush3.msra.mxu1 %v3917_v42  ;;  %3494 = vmatprep.mubr.msk.f32.mxu1 %vm3804_vm0, %v3805_v1 }
0x23ee   :  { %3620 = vmatprep.subr.bf16.mxu1 %v3803_v0 }
0x24bf   :  { %v2153_v52 = vpop.f32.mrb[24].mxu1 }
0x24c0   :  { %v2160_v53 = vrot.slane %v2153_v52, %v3936_v7  ;;  %v3486_v54 = vpop.f32.mrb[25].mxu1 }
0x24c2   :  { %2162 = vrot.lane.b32.xlu0 %v2160_v53, %s3806_s1 }
0x2534   :  { %v2163_v21 = vpop.permute.xlu0 %2162 }
0x2535   :  { %v2165_v55 = vadd.f32 %v2163_v21, %v3883_v28 }
0x2537   :  { %3709 = vtanh.f32 %v2165_v55 }
0x2541   :  { %v3710_v56 = vpop.eup %3709 }
0x2542   :  { %2168 = vrot.lane.b32.xlu1 %v3710_v56, %s3807_s6 }
0x25b4   :  { %v2169_v57 = vpop.permute.xlu1 %2168 }
0x25b5   :  { %3488 = vmatpush3.xpose.msk.msra.mxu0 %vm62_vm1, %v2169_v57 }
0x25b6   :  { %3497 = vmatprep.subr.mxu0 %v3805_v1 }
0x25b8   :  { %3490 = vmatmul.mubr.msk.f32.vlgmr.msra.gmra.mrb[24].mxu0 %vm62_vm1, %v3943_v15 }
0x25b9   :  { %3499 = vmatprep.mubr.msk.f32.mxu0 %vm3804_vm0, %v3805_v1 }
0x268b   :  { %v2238_v58 = vpop.f32.mrb[24].mxu0 }
0x268c   :  { %v3491_v59 = vpop.f32.mrb[25].mxu0  ;;  %v2242_v60 = vsel %vm694_vm2, %v2238_v58, -inf }
0x268d   :  { %2243 = vmax.xlane.f32.xlu0 %v2242_v60 }
0x271a   :  { %v2244_v2 = vpop.xlane.xlu0 %2243 }
0x271b   :  { %v2245_v3 = vsub.f32 %v2238_v58, %v2244_v2 }
0x271d   :  { %v2246_v6 = vmul.f32 1.442695, %v2245_v3 }
0x271f   :  { %3711 = vpow2.f32 %v2246_v6 }
0x2729   :  { %v3712_v8 = vpop.eup %3711 }
0x272a   :  { %v2248_v9 = vsel %vm694_vm2, %v3712_v8, 0.0 }
0x272b   :  { %2249 = vadd.xlane.f32.xlu1 %v2248_v9 }
0x27b8   :  { %v2250_v10 = vpop.xlane.xlu1 %2249 }
0x27b9   :  { %3713 = vrcp.f32 %v2250_v10 }
0x27c3   :  { %v3714_v11 = vpop.eup %3713 }
0x27c4   :  { %v2252_v12 = vmul.f32 %v3714_v11, %v3712_v8 }
0x27c6   :  { %3495 = vmatmul.mubr.msk.f32.vlgmr.msra.gmra.mrb[26].mxu1 %vm706_vm3, %v2252_v12 }
0x27c7   :  { %3622 = vmatpush3.bf16.msra.mxu1 %v3889_v34  ;;  %3510 = vmatprep.mubr.msk.f32.mxu1 %vm3804_vm0, %v3805_v1 }
0x27c8   :  { %3623 = vmatprep.subr.bf16.mxu1 %v3803_v0 }
0x27cb   :  { %3625 = vmatpush3.bf16.msra.mxu1 %v3894_v38  ;;  %v4180_v38 = vsel %vm1738_vm9, -1e+18, %v4087_v44 }
0x27cc   :  { %3529 = vmatprep.subr.mxu1 %v3805_v1 }
0x27ce   :  { %3511 = vmatmul.mubr.msk.f32.vlgmr.msra.gmra.mrb[28].mxu1 %vm62_vm1, %v4118_v26 }
0x27cf   :  { %3531 = vmatprep.mubr.msk.f32.mxu1 %vm3804_vm0, %v3805_v1 }
0x2899   :  { %v2322_v13 = vpop.f32.mrb[26].mxu1 }
0x289a   :  { %v2329_v14 = vrot.slane %v2322_v13, %v3936_v7  ;;  %v3496_v17 = vpop.f32.mrb[27].mxu1 }
0x289c   :  { %v2330_v34 = vadd.f32 %v2329_v14, %v3883_v28 }
0x289e   :  { %3715 = vtanh.f32 %v2330_v34 }
0x28a1   :  { %v2498_v18 = vpop.f32.mrb[28].mxu1 }
0x28a2   :  { %v3512_v19 = vpop.f32.mrb[29].mxu1 }
0x28a8   :  { %v3716_v20 = vpop.eup %3715 }
0x28a9   :  { %3498 = vmatpush3.xpose.msk.msra.mxu0 %vm62_vm1, %v3716_v20 }
0x28aa   :  { %3513 = vmatprep.subr.mxu0 %v3805_v1 }
0x28ac   :  { %3500 = vmatmul.mubr.msk.f32.vlgmr.msra.gmra.mrb[26].mxu0 %vm62_vm1, %v3985_v61 }
0x28ad   :  { %3514 = vmatpush3.msra.mxu0 %v3887_v30  ;;  %3515 = vmatprep.mubr.msk.f32.mxu0 %vm3804_vm0, %v3805_v1 }
0x28ae   :  { %3626 = vmatprep.subr.bf16.mxu0 %v3803_v0 }
0x297f   :  { %v2401_v23 = vpop.f32.mrb[26].mxu0 }
0x2980   :  { %v2402_v24 = vadd.f32 %v2401_v23, %v4180_v38  ;;  %v3501_v25 = vpop.f32.mrb[27].mxu0 }
0x2982   :  { %v2405_v26 = vsel %vm694_vm2, %v2402_v24, -inf }
0x2983   :  { %2406 = vmax.xlane.f32.xlu0 %v2405_v26 }
0x2a10   :  { %v2407_v43 = vpop.xlane.xlu0 %2406 }
0x2a11   :  { %vm2408_vm10 = vcmp.eq.f32.partialorder %v2402_v24, %v2407_v43 }
0x2a12   :  { %v2409_v30 = vsel %vm2408_vm10, %v3996_v4, 8 }
0x2a13   :  { %v2410_v27 = vsel %vm694_vm2, %v2409_v30, 2147483647 }
0x2a14   :  { %v2412_v29 = vshra.s32 %v2410_v27, 16  ;;  %v2411_v32 = vand.u32 65535, %v2410_v27 }
0x2a16   :  { %v2414_v31 = vcvt.s32.f32 %v2412_v29  ;;  %v2413_v44 = vcvt.s32.f32 %v2411_v32 }
0x2a18   :  { %2415 = vmin.xlane.f32.xlu0 %v2414_v31 }
0x2aa5   :  { %v2416_v63 = vpop.xlane.xlu0 %2415 }
0x2aa6   :  { %vm2417_vm11 = vcmp.eq.f32.partialorder %v2414_v31, %v2416_v63  ;;  %v2422_v35 = vcvt.f32.s32 %v2416_v63 }
0x2aa7   :  { %v2418_v33 = vsel %vm2417_vm11, %v2413_v44, inf }
0x2aa8   :  { %2419 = vmin.xlane.f32.xlu1 %v2418_v33  ;;  %v2423_v37 = vshll.u32 %v2422_v35, 16 }
0x2b35   :  { %v2420_v36 = vpop.xlane.xlu1 %2419 }
0x2b36   :  { %v2421_v39 = vcvt.f32.s32 %v2420_v36 }
0x2b38   :  { %v4186_v40 = vadd.s32 %v2423_v37, %v2421_v39 }
0x2b3a   :  { %vm2425_vm12 = vcmp.eq.s32.totalorder %v3996_v4, %v4186_v40  ;;  %3636 = vpush %v4186_v40 }
0x2b3b   :  { %v3172_v45 = vsel %vm2425_vm12, 1.0, %v3805_v1 }
0x2b3c   :  { %3516 = vmatmul.mubr.msk.f32.vlgmr.msra.gmra.mrb[28].mxu0 %vm706_vm3, %v3172_v45 }
0x2b3d   :  { %3628 = vmatpush3.bf16.msra.mxu0 %v3867_v16  ;;  %3526 = vmatprep.mubr.msk.f32.mxu0 %vm3804_vm0, %v3805_v1 }
0x2b3e   :  { %3629 = vmatprep.subr.bf16.mxu0 %v3803_v0 }
0x2b41   :  { %3631 = vmatpush3.bf16.msra.mxu0 %v3871_v22 }
0x2b42   :  { %3539 = vmatprep.subr.mxu0 %v3805_v1 }
0x2b6b   :  { %s3637_s10 = spop %3636 }
0x2b6c   :  { %2428 = sst [smem:[#allocation7 + $0x2]] %s3637_s10 }
0x2c0f   :  { %v2571_v47 = vpop.f32.mrb[28].mxu0 }
0x2c10   :  { %v2572_v48 = vadd.f32 %v2571_v47, %v2498_v18  ;;  %v3517_v62 = vpop.f32.mrb[29].mxu0 }
0x2c12   :  { %v2575_v49 = vadd.f32 %v2572_v48, %v3919_v46  ;;  %v2429_v48 = vsel %vm2425_vm12, -1e+18, %v4180_v38 }
0x2c14   :  { %3717 = vtanh.f32 %v2575_v49  ;;  %v3175_v16 = vmul.f32 -1.442695, %v2575_v49 }
0x2c16   :  { %3719 = vpow2.f32 %v3175_v16 }
0x2c1e   :  { %v3718_v50 = vpop.eup %3717 }
0x2c1f   :  { %2585 = vrot.lane.b32.xlu0 %v3718_v50, %s3808_s7 }
0x2c20   :  { %v3720_v51 = vpop.eup %3719 }
0x2c21   :  { %v2579_v52 = vadd.f32 1.0, %v3720_v51 }
0x2c23   :  { %3721 = vrcp.f32 %v2579_v52 }
0x2c2d   :  { %v3722_v0 = vpop.eup %3721 }
0x2c2e   :  { %v2583_v54 = vmul.f32 %v3722_v0, %v4113_v5 }
0x2c91   :  { %v2586_v22 = vpop.permute.xlu0 %2585 }
0x2c92   :  { %v2588_v53 = vmul.f32 %v3722_v0, %v2586_v22 }
0x2c94   :  { %2590 = vrot.lane.b32.xlu1 %v2588_v53, %s3806_s1 }
0x2d06   :  { %v2591_v21 = vpop.permute.xlu1 %2590 }
0x2d07   :  { %v2593_v55 = vadd.f32 %v2591_v21, %v2583_v54 }
0x2d09   :  { %3723 = vtanh.f32 %v2593_v55 }
0x2d13   :  { %v3724_v46 = vpop.eup %3723 }
0x2d14   :  { %2596 = vrot.lane.b32.xlu1 %v3724_v46, %s3808_s7 }
0x2d86   :  { %v2597_v56 = vpop.permute.xlu1 %2596 }
0x2d87   :  { %v2599_v57 = vmul.f32 %v3722_v0, %v2597_v56 }
0x2d89   :  { %2601 = vrot.lane.b32.xlu0 %v2599_v57, %s3806_s1 }
0x2dfb   :  { %v2602_v58 = vpop.permute.xlu0 %2601 }
0x2dfc   :  { %3527 = vmatmul.mubr.msk.f32.vlgmr.msra.gmra.mrb[30].mxu0 %vm62_vm1, %v2602_v58 }
0x2dfd   :  { %3541 = vmatprep.mubr.msk.f32.mxu0 %vm3804_vm0, %v3805_v1 }
0x2ecf   :  { %v2671_v59 = vpop.f32.mrb[30].mxu0 }
0x2ed0   :  { %v2678_v60 = vrot.slane %v2671_v59, %v3936_v7  ;;  %v3528_v5 = vpop.f32.mrb[31].mxu0 }
0x2ed2   :  { %2680 = vrot.lane.b32.xlu1 %v2678_v60, %s3806_s1 }
0x2f44   :  { %v2681_v2 = vpop.permute.xlu1 %2680 }
0x2f45   :  { %v2683_v3 = vadd.f32 %v2681_v2, %v3883_v28 }
0x2f47   :  { %3725 = vtanh.f32 %v2683_v3 }
0x2f51   :  { %v3726_v6 = vpop.eup %3725 }
0x2f52   :  { %2686 = vrot.lane.b32.xlu0 %v3726_v6, %s3807_s6 }
0x2fc4   :  { %v2687_v8 = vpop.permute.xlu0 %2686 }
0x2fc5   :  { %3530 = vmatpush3.xpose.msk.msra.mxu1 %vm62_vm1, %v2687_v8 }
0x2fc6   :  { %3534 = vmatprep.subr.mxu1 %v3805_v1 }
0x2fc8   :  { %3532 = vmatmul.mubr.msk.f32.vlgmr.msra.gmra.mrb[30].mxu1 %vm62_vm1, %v3943_v15 }
0x2fc9   :  { %3535 = vmatpush3.msra.mxu1 %v3915_v41  ;;  %3536 = vmatprep.mubr.msk.f32.mxu1 %vm3804_vm0, %v3805_v1 }
0x2fca   :  { %3544 = vmatprep.subr.mxu1 %v3805_v1 }
0x309b   :  { %v2756_v9 = vpop.f32.mrb[30].mxu1 }
0x309c   :  { %v3533_v10 = vpop.f32.mrb[31].mxu1  ;;  %v2760_v11 = vsel %vm694_vm2, %v2756_v9, -inf }
0x309d   :  { %2761 = vmax.xlane.f32.xlu1 %v2760_v11 }
0x312a   :  { %v2762_v12 = vpop.xlane.xlu1 %2761 }
0x312b   :  { %v2763_v13 = vsub.f32 %v2756_v9, %v2762_v12 }
0x312d   :  { %v2764_v14 = vmul.f32 1.442695, %v2763_v13 }
0x312f   :  { %3727 = vpow2.f32 %v2764_v14 }
0x3139   :  { %v3728_v17 = vpop.eup %3727 }
0x313a   :  { %v2766_v34 = vsel %vm694_vm2, %v3728_v17, 0.0 }
0x313b   :  { %2767 = vadd.xlane.f32.xlu0 %v2766_v34 }
0x31c8   :  { %v2768_v18 = vpop.xlane.xlu0 %2767 }
0x31c9   :  { %3729 = vrcp.f32 %v2768_v18 }
0x31d3   :  { %v3730_v41 = vpop.eup %3729 }
0x31d4   :  { %v2770_v19 = vmul.f32 %v3730_v41, %v3728_v17 }
0x31d6   :  { %3537 = vmatmul.mubr.msk.f32.vlgmr.msra.gmra.mrb[32].mxu1 %vm706_vm3, %v2770_v19 }
0x31d7   :  { %3545 = vmatpush3.msra.mxu1 %v3917_v42  ;;  %3546 = vmatprep.mubr.msk.f32.mxu1 %vm3804_vm0, %v3805_v1 }
0x32a9   :  { %v2840_v20 = vpop.f32.mrb[32].mxu1 }
0x32aa   :  { %v2847_v23 = vrot.slane %v2840_v20, %v3936_v7  ;;  %v3538_v24 = vpop.f32.mrb[33].mxu1 }
0x32ac   :  { %2849 = vrot.lane.b32.xlu0 %v2847_v23, %s3806_s1 }
0x331e   :  { %v2850_v25 = vpop.permute.xlu0 %2849 }
0x331f   :  { %v2852_v26 = vadd.f32 %v2850_v25, %v3883_v28 }
0x3321   :  { %3731 = vtanh.f32 %v2852_v26 }
0x332b   :  { %v3732_v43 = vpop.eup %3731 }
0x332c   :  { %2855 = vrot.lane.b32.xlu1 %v3732_v43, %s3807_s6 }
0x339e   :  { %v2856_v30 = vpop.permute.xlu1 %2855 }
0x339f   :  { %3540 = vmatpush3.xpose.msk.msra.mxu0 %vm62_vm1, %v2856_v30 }
0x33a0   :  { %3549 = vmatprep.subr.mxu0 %v3805_v1 }
0x33a2   :  { %3542 = vmatmul.mubr.msk.f32.vlgmr.msra.gmra.mrb[32].mxu0 %vm62_vm1, %v3943_v15 }
0x33a3   :  { %3551 = vmatprep.mubr.msk.f32.mxu0 %vm3804_vm0, %v3805_v1 }
0x3475   :  { %v2925_v42 = vpop.f32.mrb[32].mxu0 }
0x3476   :  { %v3543_v27 = vpop.f32.mrb[33].mxu0  ;;  %v2929_v29 = vsel %vm694_vm2, %v2925_v42, -inf }
0x3477   :  { %2930 = vmax.xlane.f32.xlu1 %v2929_v29 }
0x3504   :  { %v2931_v31 = vpop.xlane.xlu1 %2930 }
0x3505   :  { %v2932_v32 = vsub.f32 %v2925_v42, %v2931_v31 }
0x3507   :  { %v2933_v63 = vmul.f32 1.442695, %v2932_v32 }
0x3509   :  { %3733 = vpow2.f32 %v2933_v63 }
0x3513   :  { %v3734_v44 = vpop.eup %3733 }
0x3514   :  { %v2935_v33 = vsel %vm694_vm2, %v3734_v44, 0.0 }
0x3515   :  { %2936 = vadd.xlane.f32.xlu0 %v2935_v33 }
0x35a2   :  { %v2937_v35 = vpop.xlane.xlu0 %2936 }
0x35a3   :  { %3735 = vrcp.f32 %v2937_v35 }
0x35ad   :  { %v3736_v36 = vpop.eup %3735 }
0x35ae   :  { %v2939_v15 = vmul.f32 %v3736_v36, %v3734_v44 }
0x35b0   :  { %3547 = vmatmul.mubr.msk.f32.vlgmr.msra.gmra.mrb[34].mxu1 %vm706_vm3, %v2939_v15 }
0x3683   :  { %v3009_v1 = vpop.f32.mrb[34].mxu1 }
0x3684   :  { %v3016_v37 = vrot.slane %v3009_v1, %v3936_v7  ;;  %v3548_v39 = vpop.f32.mrb[35].mxu1 }
0x3686   :  { %v3017_v45 = vadd.f32 %v3016_v37, %v3883_v28 }
0x3688   :  { %3737 = vtanh.f32 %v3017_v45 }
0x3692   :  { %v3738_v47 = vpop.eup %3737 }
0x3693   :  { %3550 = vmatpush3.xpose.msk.msra.mxu0 %vm62_vm1, %v3738_v47 }
0x3696   :  { %3552 = vmatmul.mubr.msk.f32.vlgmr.msra.gmra.mrb[34].mxu0 %vm62_vm1, %v3985_v61 }
0x3769   :  { %v3088_v62 = vpop.f32.mrb[34].mxu0 }
0x376a   :  { %v3089_v49 = vadd.f32 %v3088_v62, %v2429_v48  ;;  %v3553_v50 = vpop.f32.mrb[35].mxu0 }
0x376c   :  { %v3092_v7 = vsel %vm694_vm2, %v3089_v49, -inf }
0x376d   :  { %3093 = vmax.xlane.f32.xlu0 %v3092_v7 }
0x37fa   :  { %v3094_v16 = vpop.xlane.xlu0 %3093 }
0x37fb   :  { %vm3095_vm13 = vcmp.eq.f32.partialorder %v3089_v49, %v3094_v16 }
0x37fc   :  { %v3096_v28 = vsel %vm3095_vm13, %v3996_v4, 8 }
0x37fd   :  { %v3097_v51 = vsel %vm694_vm2, %v3096_v28, 2147483647 }
0x37fe   :  { %v3099_v52 = vshra.s32 %v3097_v51, 16  ;;  %v3098_v61 = vand.u32 65535, %v3097_v51 }
0x3800   :  { %v3101_v0 = vcvt.s32.f32 %v3099_v52  ;;  %v3100_v53 = vcvt.s32.f32 %v3098_v61 }
0x3802   :  { %3102 = vmin.xlane.f32.xlu1 %v3101_v0 }
0x388f   :  { %v3103_v22 = vpop.xlane.xlu1 %3102 }
0x3890   :  { %vm3104_vm14 = vcmp.eq.f32.partialorder %v3101_v0, %v3103_v22  ;;  %v3109_v40 = vcvt.f32.s32 %v3103_v22 }
0x3891   :  { %v3105_v38 = vsel %vm3104_vm14, %v3100_v53, inf }
0x3892   :  { %3106 = vmin.xlane.f32.xlu0 %v3105_v38  ;;  %v3110_v21 = vshll.u32 %v3109_v40, 16 }
0x391f   :  { %v3107_v54 = vpop.xlane.xlu0 %3106 }
0x3920   :  { %v3108_v55 = vcvt.f32.s32 %v3107_v54 }
0x3922   :  { %v3111_v46 = vadd.s32 %v3110_v21, %v3108_v55 }
0x3924   :  { %3638 = vpush %v3111_v46 }
0x3955   :  { %s3639_s11 = spop %3638 }
0x3956   :  { %3114 = sst [smem:[#allocation7 + $0x3]] %s3639_s11 }
0x3957   :  { %3792 = shalt.err (!%p3789_p4)
}
0x3958   :  { %s3809_s19 = smov [#allocation7]  }
0x3959   :  { %3122 = dma.smem_to_hbm %s3809_s19, 16, %s4268_s2, [#allocation4]  }
0x395a   :  { %3797 = dma.done.wait [#allocation4], 16  }
0x395b   :  { %3798 = vsyncadd [#allocation4], 4294967280 }
0x395c   :  { %3126 = sfence }
0x395d   :  { %3127 = vsyncpa [#allocation3], 1 }
0x395e   :  { %3128 = vsyncpa [#allocation6], 1 }
0x395f   :  { %3129 = vsyncpa [#allocation4], 1 }

</bundles_post_ra>
